<compile_context>
chip_gen: v7x
topology: tpu7x:2x2x1
jax: 0.10.0
libtpu: 0.0.40
codegen_flags: <defaults>
</compile_context>

<pallas_src>
import functools

import jax
import jax.numpy as jnp
from jax import lax
from jax.experimental import pallas as pl
from jax.experimental.pallas import tpu as pltpu

LANE = 128  # TPU lane width; channel dims are padded to a multiple of this.


def _round_up(x, m):
    return (x + m - 1) // m * m


# ------------------------------- kernel --------------------------------------


def decoder_block_kernel(x_ref, w1_ref, w3_ref, s1_ref, b1_ref, s2_ref, b2_ref,
                         s3_ref, b3_ref, o_ref, col1_ref, y_ref, col3_ref):
    """One (batch image, row tile) step of the fused decoder block.

    x_ref   : (H+3, W+2, Cip)   zero-padded NHWC input (compute dtype);
                                rows: 1 top + 2 bottom pad, cols: 1 + 1 pad
    w1_ref  : (9*Cip, Cop)      conv1 weight, im2col layout (compute dtype)
    w3_ref  : (4*Cop, 4*Nfp)    conv3 folded with nearest-x2 upsample: four 2x2
                                kernels (one per output row/col parity) packed
                                into a single matmul RHS (compute dtype)
    s*/b*   : (1,Cop)/(1,4*Nfp) folded BN scale / bias (f32)
    o_ref   : (Th, W-1, 4*Nfp)  parity-packed output tile
    col1_ref: VMEM (Th+1, W, 9*Cip)  conv1 im2col scratch      (compute dtype)
    y_ref   : VMEM (Th+1, W, Cop)    BN2+ReLU activations      (compute dtype)
    col3_ref: VMEM (Th, W-1, 4*Cop)  parity-conv im2col scratch(compute dtype)
    """
    tc, wim, cout_p = y_ref.shape      # tc = row_tile + 1 (1-row halo below)
    th = tc - 1
    wo2 = wim - 1                      # output columns per parity class
    cin_p = w1_ref.shape[0] // 9
    nf4 = w3_ref.shape[1]
    cdt = w1_ref.dtype

    row0 = pl.multiple_of(pl.program_id(1) * th, th)

    # -- conv1 (3x3, pad=1): im2col with K = 9*Cip, ONE MXU matmul.  Windows are
    #    read straight from the halo'd input block (no padding pass) and the
    #    128-aligned tap offsets keep every store unmasked.
    for kh in range(3):
        for kw in range(3):
            tap = kh * 3 + kw
            col1_ref[:, :, tap * cin_p:(tap + 1) * cin_p] = (
                x_ref[pl.ds(row0 + kh, tc), pl.ds(kw, wim), :])
    acc1 = jnp.dot(col1_ref[...].reshape(tc * wim, 9 * cin_p), w1_ref[...],
                   preferred_element_type=jnp.float32)          # (tc*W, Cop) f32

    # -- BN1+ReLU then BN2+ReLU.  BN2/ReLU commute with nearest upsampling, so
    #    they run on H*W activations instead of 4*H*W.
    y = jnp.maximum(acc1 * s1_ref[...] + b1_ref[...], 0.0)
    y = jnp.maximum(y * s2_ref[...] + b2_ref[...], 0.0)
    y_ref[...] = y.reshape(tc, wim, cout_p).astype(cdt)

    # -- conv3(3x3,valid) after nearest-x2 upsample == four 2x2 convs over the
    #    *un-upsampled* activations (weights pre-combined per output parity in
    #    the wrapper).  Single im2col with K = 4*Cop, single MXU matmul with
    #    N = 4*Nfp lanes; no upsampled tensor is ever materialized.
    for p in range(2):
        for q in range(2):
            slot = p * 2 + q
            col3_ref[:, :, slot * cout_p:(slot + 1) * cout_p] = (
                y_ref[p:p + th, q:q + wo2, :])
    acc3 = jnp.dot(col3_ref[...].reshape(th * wo2, 4 * cout_p), w3_ref[...],
                   preferred_element_type=jnp.float32)          # (Th*(W-1), 4*Nfp)

    # -- BN3 + ReLU, lane-dense parity-packed store.
    o_ref[...] = jnp.maximum(acc3 * s3_ref[...] + b3_ref[...], 0.0
                             ).reshape(th, wo2, nf4).astype(o_ref.dtype)


# ------------------------------- wrapper --------------------------------------


def _vmem_limit_bytes():
    # ~3/4 of physical VMEM: ~96 MiB on v5e/v6e (128 MiB), ~48 MiB on v7x (64).
    try:
        cap = pltpu.get_tpu_info().vmem_capacity_bytes
        return min(int(cap) * 3 // 4, 96 * 1024 * 1024)
    except Exception:
        return 48 * 1024 * 1024


def _pick_row_tile(h, w, cin_p, cout_p, nf_p, act_isz, out_isz, vmem_limit):
    """Largest divisor of H whose per-tile buffers fit the VMEM budget."""
    fixed = (2 * (h + 3) * (w + 2) * cin_p * act_isz                 # x block x2
             + 2 * (9 * cin_p * cout_p + 16 * cout_p * nf_p) * act_isz)  # weights
    budget = max(2 << 20, (vmem_limit - fixed) // 2)
    best = 1
    for th in range(1, h + 1):
        if h % th:
            continue
        per_tile = ((th + 1) * w * (9 * cin_p + cout_p) * act_isz    # col1 + y
                    + th * (w - 1) * 4 * cout_p * act_isz            # col3
                    + 2 * th * (w - 1) * 4 * nf_p * out_isz)         # out block x2
        if per_tile <= budget:
            best = th
    return best


@functools.partial(jax.jit,
                   static_argnames=("compute_dtype", "row_tile", "out_dtype"))
def decoder_block_inception_forward(x_nchw, params, compute_dtype=jnp.bfloat16,
                                    row_tile=None, out_dtype=jnp.float32):
    """DecoderBlockInception forward (is_deconv=False, eval-mode BN), NCHW i/o.

    compute_dtype: dtype of activations/weights at the HBM/MXU boundary
                   (bf16 fast path, f32 exact path); accumulation and all
                   BN/ReLU epilogues are float32.
    out_dtype:     HBM dtype of the kernel's output slab (use bf16 to halve
                   writeback if the consumer tolerates it).
    """
    cdt = compute_dtype
    act_isz = jnp.dtype(cdt).itemsize
    out_isz = jnp.dtype(out_dtype).itemsize

    n, cin, h, w = x_nchw.shape
    cout = params["scale1"].shape[0]
    nf = params["scale3"].shape[0]
    cin_p, cout_p, nf_p = (_round_up(c, LANE) for c in (cin, cout, nf))

    vmem_limit = _vmem_limit_bytes()
    if row_tile is None:
        row_tile = _pick_row_tile(h, w, cin_p, cout_p, nf_p, act_isz, out_isz,
                                  vmem_limit)
    assert h % row_tile == 0, "row_tile must divide H"
    th, tgrid, tc, wo2 = row_tile, h // row_tile, row_tile + 1, w - 1

    # ---- input: NCHW -> NHWC, cast, pad rows (1 top, 2 bottom), cols (1, 1)
    #      and channels (-> multiple of 128) in ONE wrapper pad. ----
    x = jnp.transpose(x_nchw, (0, 2, 3, 1)).astype(cdt)
    x = jnp.pad(x, ((0, 0), (1, 2), (1, 1), (0, cin_p - cin)))

    # ---- conv1 weights -> im2col (9*Cip, Cop), lane-padded. ----
    w1 = jnp.pad(params["w1"], ((0, 0), (0, 0), (0, cin_p - cin),
                                (0, cout_p - cout)))
    w1 = w1.reshape(9 * cin_p, cout_p).astype(cdt)

    # ---- conv3 folded with the nearest-x2 upsample: for output parity (pe,qe),
    #      3x3 taps landing on the same replicated source pixel collapse, giving
    #      four 2x2 kernels; packed into one (4*Cop, 4*Nfp) matmul RHS
    #      (rows: 2x2 tap x Cop, cols: parity class x Nfp). ----
    w3 = jnp.pad(params["w3"], ((0, 0), (0, 0), (0, cout_p - cout),
                                (0, nf_p - nf)))
    r = jnp.array([[[1., 1., 0.], [0., 0., 1.]],    # even output row/col parity
                   [[1., 0., 0.], [0., 1., 1.]]],   # odd  output row/col parity
                  jnp.float32)                      # [parity, 2x2 tap, 3x3 tap]
    w3c = jnp.einsum("ipa,jqb,abco->pqcijo", r, r, w3)
    w3c = w3c.reshape(4 * cout_p, 4 * nf_p).astype(cdt)

    def pad_vec(v, cp):
        return jnp.pad(v.astype(jnp.float32), (0, cp - v.shape[0])).reshape(1, cp)

    s1, b1 = pad_vec(params["scale1"], cout_p), pad_vec(params["bias1"], cout_p)
    s2, b2 = pad_vec(params["scale2"], cout_p), pad_vec(params["bias2"], cout_p)
    s3 = jnp.tile(pad_vec(params["scale3"], nf_p), (1, 4))
    b3 = jnp.tile(pad_vec(params["bias3"], nf_p), (1, 4))

    out4 = pl.pallas_call(
        decoder_block_kernel,
        out_shape=jax.ShapeDtypeStruct((n, h, wo2, 4 * nf_p), out_dtype),
        grid=(n, tgrid),
        in_specs=[
            pl.BlockSpec((None, h + 3, w + 2, cin_p), lambda b, i: (b, 0, 0, 0)),
            pl.BlockSpec((9 * cin_p, cout_p), lambda b, i: (0, 0)),
            pl.BlockSpec((4 * cout_p, 4 * nf_p), lambda b, i: (0, 0)),
            pl.BlockSpec((1, cout_p), lambda b, i: (0, 0)),
            pl.BlockSpec((1, cout_p), lambda b, i: (0, 0)),
            pl.BlockSpec((1, cout_p), lambda b, i: (0, 0)),
            pl.BlockSpec((1, cout_p), lambda b, i: (0, 0)),
            pl.BlockSpec((1, 4 * nf_p), lambda b, i: (0, 0)),
            pl.BlockSpec((1, 4 * nf_p), lambda b, i: (0, 0)),
        ],
        out_specs=pl.BlockSpec((None, th, wo2, 4 * nf_p),
                               lambda b, i: (b, i, 0, 0)),
        scratch_shapes=[
            pltpu.VMEM((tc, w, 9 * cin_p), cdt),     # conv1 im2col
            pltpu.VMEM((tc, w, cout_p), cdt),        # BN2+ReLU activations
            pltpu.VMEM((th, wo2, 4 * cout_p), cdt),  # parity-conv im2col
        ],
        compiler_params=pltpu.CompilerParams(
            dimension_semantics=("parallel", "parallel"),
            vmem_limit_bytes=vmem_limit),
    )(x, w1, w3c, s1, b1, s2, b2, s3, b3)

    # ---- parity de-interleave + NHWC->NCHW + row trim: one fused XLA copy
    #      (replaces the plain NHWC->NCHW transpose that was needed anyway). ----
    out6 = out4.reshape(n, h, wo2, 2, 2, nf_p)          # [n, r, c, pe, qe, o]
    y = jnp.transpose(out6, (0, 5, 1, 3, 2, 4)).reshape(n, nf_p, 2 * h, 2 * wo2)
    return y[:, :nf, :2 * h - 2, :]


# --------------------- deterministic parameter setup -------------------------


def make_params(key, in_channels, out_channels, n_filters, eps=1e-5):
    ks = jax.random.split(key, 16)
    f32 = jnp.float32

    w1_oihw = jax.random.normal(ks[0], (out_channels, in_channels, 3, 3), f32)
    w1_oihw = w1_oihw * (1.0 / jnp.sqrt(9.0 * in_channels))
    b1 = jax.random.normal(ks[1], (out_channels,), f32) * 0.1

    w3_oihw = jax.random.normal(ks[2], (n_filters, out_channels, 3, 3), f32)
    w3_oihw = w3_oihw * (1.0 / jnp.sqrt(9.0 * out_channels))
    b3 = jax.random.normal(ks[3], (n_filters,), f32) * 0.1

    def bn_params(kg, kb, km, kv, c):
        gamma = 1.0 + 0.1 * jax.random.normal(kg, (c,), f32)
        beta = 0.1 * jax.random.normal(kb, (c,), f32)
        mean = 0.1 * jax.random.normal(km, (c,), f32)
        var = 0.5 + jax.random.uniform(kv, (c,), f32)
        return gamma, beta, mean, var

    g1, be1, m1, v1 = bn_params(ks[4], ks[5], ks[6], ks[7], out_channels)
    g2, be2, m2, v2 = bn_params(ks[8], ks[9], ks[10], ks[11], out_channels)
    g3, be3, m3, v3 = bn_params(ks[12], ks[13], ks[14], ks[15], n_filters)

    # Fold (inference-mode) BN and conv bias into per-channel scale / bias.
    s1 = g1 / jnp.sqrt(v1 + eps)
    bias1 = (b1 - m1) * s1 + be1
    s2 = g2 / jnp.sqrt(v2 + eps)
    bias2 = be2 - m2 * s2
    s3 = g3 / jnp.sqrt(v3 + eps)
    bias3 = (b3 - m3) * s3 + be3

    kernel_params = {
        # conv weights in (KH, KW, Cin, Cout) layout; lane padding and the
        # upsample/parity folding of w3 happen in the forward wrapper.
        "w1": jnp.transpose(w1_oihw, (2, 3, 1, 0)),
        "w3": jnp.transpose(w3_oihw, (2, 3, 1, 0)),
        "scale1": s1, "bias1": bias1,
        "scale2": s2, "bias2": bias2,
        "scale3": s3, "bias3": bias3,
    }
    raw = dict(w1_oihw=w1_oihw, b1=b1, w3_oihw=w3_oihw, b3=b3,
               g1=g1, be1=be1, m1=m1, v1=v1,
               g2=g2, be2=be2, m2=m2, v2=v2,
               g3=g3, be3=be3, m3=m3, v3=v3)
    return kernel_params, raw


def reference_forward(x, raw, eps=1e-5, cast_dtype=None):
    """Pure-JAX reference of the PyTorch forward (BN in eval mode).

    cast_dtype=None      : exact float32 module math.
    cast_dtype=bfloat16  : same precision policy as the bf16 kernel path
                           (conv inputs/weights rounded to bf16, f32 accum).
    """
    def cast(a):
        if cast_dtype is None:
            return a
        return a.astype(cast_dtype).astype(jnp.float32)

    def conv(x, w, b, pad):
        y = lax.conv_general_dilated(
            cast(x), cast(w), (1, 1), [(pad, pad), (pad, pad)],
            dimension_numbers=("NCHW", "OIHW", "NCHW"))
        return y + b[None, :, None, None]

    def bn(x, g, b, m, v):
        return ((x - m[None, :, None, None])
                / jnp.sqrt(v[None, :, None, None] + eps)
                * g[None, :, None, None] + b[None, :, None, None])

    x = jnp.maximum(bn(conv(x, raw["w1_oihw"], raw["b1"], 1),
                       raw["g1"], raw["be1"], raw["m1"], raw["v1"]), 0.0)
    x = jnp.repeat(jnp.repeat(x, 2, axis=2), 2, axis=3)   # nearest 2x upsample
    x = jnp.maximum(bn(x, raw["g2"], raw["be2"], raw["m2"], raw["v2"]), 0.0)
    x = jnp.maximum(bn(conv(x, raw["w3_oihw"], raw["b3"], 0),
                       raw["g3"], raw["be3"], raw["m3"], raw["v3"]), 0.0)
    return x


# ------------------------------- main ----------------------------------------


if __name__ == "__main__":
    # Small shapes consistent with the module (defaults scaled down):
    # batch=2, in_channels=8, out_channels=8, n_filters=16, H=W=8.
    batch, in_channels, out_channels, n_filters, hw = 2, 8, 8, 16, 8

    key = jax.random.PRNGKey(0)
    k_x, k_p = jax.random.split(key)
    x = jax.random.normal(k_x, (batch, in_channels, hw, hw), jnp.float32)  # NCHW

    params, raw = make_params(k_p, in_channels, out_channels, n_filters)
    out_shape = (batch, n_filters, 2 * hw - 2, 2 * hw - 2)

    # --- fast path: bf16 HBM/MXU boundary, f32 accumulation.  row_tile=4 so the
    #     spatial-tile grid axis (with its 1-row halo) is actually exercised. ---
    out_bf16 = jax.block_until_ready(
        decoder_block_inception_forward(x, params, row_tile=4))
    ref_bf16 = jax.block_until_ready(
        reference_forward(x, raw, cast_dtype=jnp.bfloat16))
    assert out_bf16.shape == out_shape, out_bf16.shape
    assert jnp.allclose(out_bf16, ref_bf16, atol=3e-2, rtol=3e-2), (
        float(jnp.max(jnp.abs(out_bf16 - ref_bf16))))

    # --- exact float32 path, default (auto) row tile: checked tightly against
    #     the pure-f32 module math. ---
    out_f32 = jax.block_until_ready(
        decoder_block_inception_forward(x, params, compute_dtype=jnp.float32))
    ref_f32 = jax.block_until_ready(reference_forward(x, raw))
    assert out_f32.shape == out_shape, out_f32.shape
    assert jnp.allclose(out_f32, ref_f32, atol=5e-4, rtol=5e-4), (
        float(jnp.max(jnp.abs(out_f32 - ref_f32))))

    print("KERNEL_OK")
</pallas_src>

<mosaic_0001>
module attributes {stable_mosaic.version = 11 : i64} {
  func.func @decoder_block_kernel(%arg0: i32, %arg1: i32, %arg2: memref<1x11x10x128xbf16, #tpu.memory_space<vmem>>, %arg3: memref<1152x128xbf16, #tpu.memory_space<vmem>>, %arg4: memref<512x512xbf16, #tpu.memory_space<vmem>>, %arg5: memref<1x128xf32, #tpu.memory_space<vmem>>, %arg6: memref<1x128xf32, #tpu.memory_space<vmem>>, %arg7: memref<1x128xf32, #tpu.memory_space<vmem>>, %arg8: memref<1x128xf32, #tpu.memory_space<vmem>>, %arg9: memref<1x512xf32, #tpu.memory_space<vmem>>, %arg10: memref<1x512xf32, #tpu.memory_space<vmem>>, %arg11: memref<1x4x7x512xf32, #tpu.memory_space<vmem>>, %arg12: memref<5x8x1152xbf16, #tpu.memory_space<vmem>>, %arg13: memref<5x8x128xbf16, #tpu.memory_space<vmem>>, %arg14: memref<4x7x512xbf16, #tpu.memory_space<vmem>>) attributes {dimension_semantics = [#tpu.dimension_semantics<parallel>, #tpu.dimension_semantics<parallel>], iteration_bounds = array<i64: 2, 2>, scalar_prefetch = 0 : i64, scratch_operands = 3 : i64, tpu.core_type = #tpu.core_type<tc>, window_params = [{transform_indices = @transform_0, window_bounds = array<i64: 1, 11, 10, 128>}, {pipeline_mode = #tpu.pipeline_mode<synchronous>, transform_indices = @transform_1, window_bounds = array<i64: 1152, 128>}, {pipeline_mode = #tpu.pipeline_mode<synchronous>, transform_indices = @transform_2, window_bounds = array<i64: 512, 512>}, {pipeline_mode = #tpu.pipeline_mode<synchronous>, transform_indices = @transform_3, window_bounds = array<i64: 1, 128>}, {pipeline_mode = #tpu.pipeline_mode<synchronous>, transform_indices = @transform_4, window_bounds = array<i64: 1, 128>}, {pipeline_mode = #tpu.pipeline_mode<synchronous>, transform_indices = @transform_5, window_bounds = array<i64: 1, 128>}, {pipeline_mode = #tpu.pipeline_mode<synchronous>, transform_indices = @transform_6, window_bounds = array<i64: 1, 128>}, {pipeline_mode = #tpu.pipeline_mode<synchronous>, transform_indices = @transform_7, window_bounds = array<i64: 1, 512>}, {pipeline_mode = #tpu.pipeline_mode<synchronous>, transform_indices = @transform_8, window_bounds = array<i64: 1, 512>}, {transform_indices = @transform_9, window_bounds = array<i64: 1, 4, 7, 512>}]} {
    %c4_i32 = arith.constant 4 : i32
    %0 = arith.muli %arg1, %c4_i32 : i32
    %1 = tpu.assume_multiple %0, 4 : i32
    %c0_i32 = arith.constant 0 : i32
    %2 = arith.addi %1, %c0_i32 : i32
    %c0 = arith.constant 0 : index
    %3 = arith.index_cast %2 : i32 to index
    %c0_0 = arith.constant 0 : index
    %c0_1 = arith.constant 0 : index
    %4 = vector.load %arg2[%c0, %3, %c0_0, %c0_1] : memref<1x11x10x128xbf16, #tpu.memory_space<vmem>>, vector<1x5x8x128xbf16>
    %5 = vector.shape_cast %4 : vector<1x5x8x128xbf16> to vector<5x8x128xbf16>
    %c0_2 = arith.constant 0 : index
    %c0_3 = arith.constant 0 : index
    %c0_4 = arith.constant 0 : index
    %6 = vector.load %arg12[%c0_2, %c0_3, %c0_4] : memref<5x8x1152xbf16, #tpu.memory_space<vmem>>, vector<5x8x128xbf16>
    tpu.vector_store %arg12[%c0_2, %c0_3, %c0_4], %5 {strides = array<i32>} : memref<5x8x1152xbf16, #tpu.memory_space<vmem>>, vector<5x8x128xbf16>,
    %c0_i32_5 = arith.constant 0 : i32
    %7 = arith.addi %1, %c0_i32_5 : i32
    %c0_6 = arith.constant 0 : index
    %8 = arith.index_cast %7 : i32 to index
    %c1 = arith.constant 1 : index
    %c0_7 = arith.constant 0 : index
    %9 = vector.load %arg2[%c0_6, %8, %c1, %c0_7] : memref<1x11x10x128xbf16, #tpu.memory_space<vmem>>, vector<1x5x8x128xbf16>
    %10 = vector.shape_cast %9 : vector<1x5x8x128xbf16> to vector<5x8x128xbf16>
    %c0_8 = arith.constant 0 : index
    %c0_9 = arith.constant 0 : index
    %c128 = arith.constant 128 : index
    %11 = vector.load %arg12[%c0_8, %c0_9, %c128] : memref<5x8x1152xbf16, #tpu.memory_space<vmem>>, vector<5x8x128xbf16>
    tpu.vector_store %arg12[%c0_8, %c0_9, %c128], %10 {strides = array<i32>} : memref<5x8x1152xbf16, #tpu.memory_space<vmem>>, vector<5x8x128xbf16>,
    %c0_i32_10 = arith.constant 0 : i32
    %12 = arith.addi %1, %c0_i32_10 : i32
    %c0_11 = arith.constant 0 : index
    %13 = arith.index_cast %12 : i32 to index
    %c2 = arith.constant 2 : index
    %c0_12 = arith.constant 0 : index
    %14 = vector.load %arg2[%c0_11, %13, %c2, %c0_12] : memref<1x11x10x128xbf16, #tpu.memory_space<vmem>>, vector<1x5x8x128xbf16>
    %15 = vector.shape_cast %14 : vector<1x5x8x128xbf16> to vector<5x8x128xbf16>
    %c0_13 = arith.constant 0 : index
    %c0_14 = arith.constant 0 : index
    %c256 = arith.constant 256 : index
    %16 = vector.load %arg12[%c0_13, %c0_14, %c256] : memref<5x8x1152xbf16, #tpu.memory_space<vmem>>, vector<5x8x128xbf16>
    tpu.vector_store %arg12[%c0_13, %c0_14, %c256], %15 {strides = array<i32>} : memref<5x8x1152xbf16, #tpu.memory_space<vmem>>, vector<5x8x128xbf16>,
    %c1_i32 = arith.constant 1 : i32
    %17 = arith.addi %1, %c1_i32 : i32
    %c0_15 = arith.constant 0 : index
    %18 = arith.index_cast %17 : i32 to index
    %c0_16 = arith.constant 0 : index
    %c0_17 = arith.constant 0 : index
    %19 = vector.load %arg2[%c0_15, %18, %c0_16, %c0_17] : memref<1x11x10x128xbf16, #tpu.memory_space<vmem>>, vector<1x5x8x128xbf16>
    %20 = vector.shape_cast %19 : vector<1x5x8x128xbf16> to vector<5x8x128xbf16>
    %c0_18 = arith.constant 0 : index
    %c0_19 = arith.constant 0 : index
    %c384 = arith.constant 384 : index
    %21 = vector.load %arg12[%c0_18, %c0_19, %c384] : memref<5x8x1152xbf16, #tpu.memory_space<vmem>>, vector<5x8x128xbf16>
    tpu.vector_store %arg12[%c0_18, %c0_19, %c384], %20 {strides = array<i32>} : memref<5x8x1152xbf16, #tpu.memory_space<vmem>>, vector<5x8x128xbf16>,
    %c1_i32_20 = arith.constant 1 : i32
    %22 = arith.addi %1, %c1_i32_20 : i32
    %c0_21 = arith.constant 0 : index
    %23 = arith.index_cast %22 : i32 to index
    %c1_22 = arith.constant 1 : index
    %c0_23 = arith.constant 0 : index
    %24 = vector.load %arg2[%c0_21, %23, %c1_22, %c0_23] : memref<1x11x10x128xbf16, #tpu.memory_space<vmem>>, vector<1x5x8x128xbf16>
    %25 = vector.shape_cast %24 : vector<1x5x8x128xbf16> to vector<5x8x128xbf16>
    %c0_24 = arith.constant 0 : index
    %c0_25 = arith.constant 0 : index
    %c512 = arith.constant 512 : index
    %26 = vector.load %arg12[%c0_24, %c0_25, %c512] : memref<5x8x1152xbf16, #tpu.memory_space<vmem>>, vector<5x8x128xbf16>
    tpu.vector_store %arg12[%c0_24, %c0_25, %c512], %25 {strides = array<i32>} : memref<5x8x1152xbf16, #tpu.memory_space<vmem>>, vector<5x8x128xbf16>,
    %c1_i32_26 = arith.constant 1 : i32
    %27 = arith.addi %1, %c1_i32_26 : i32
    %c0_27 = arith.constant 0 : index
    %28 = arith.index_cast %27 : i32 to index
    %c2_28 = arith.constant 2 : index
    %c0_29 = arith.constant 0 : index
    %29 = vector.load %arg2[%c0_27, %28, %c2_28, %c0_29] : memref<1x11x10x128xbf16, #tpu.memory_space<vmem>>, vector<1x5x8x128xbf16>
    %30 = vector.shape_cast %29 : vector<1x5x8x128xbf16> to vector<5x8x128xbf16>
    %c0_30 = arith.constant 0 : index
    %c0_31 = arith.constant 0 : index
    %c640 = arith.constant 640 : index
    %31 = vector.load %arg12[%c0_30, %c0_31, %c640] : memref<5x8x1152xbf16, #tpu.memory_space<vmem>>, vector<5x8x128xbf16>
    tpu.vector_store %arg12[%c0_30, %c0_31, %c640], %30 {strides = array<i32>} : memref<5x8x1152xbf16, #tpu.memory_space<vmem>>, vector<5x8x128xbf16>,
    %c2_i32 = arith.constant 2 : i32
    %32 = arith.addi %1, %c2_i32 : i32
    %c0_32 = arith.constant 0 : index
    %33 = arith.index_cast %32 : i32 to index
    %c0_33 = arith.constant 0 : index
    %c0_34 = arith.constant 0 : index
    %34 = vector.load %arg2[%c0_32, %33, %c0_33, %c0_34] : memref<1x11x10x128xbf16, #tpu.memory_space<vmem>>, vector<1x5x8x128xbf16>
    %35 = vector.shape_cast %34 : vector<1x5x8x128xbf16> to vector<5x8x128xbf16>
    %c0_35 = arith.constant 0 : index
    %c0_36 = arith.constant 0 : index
    %c768 = arith.constant 768 : index
    %36 = vector.load %arg12[%c0_35, %c0_36, %c768] : memref<5x8x1152xbf16, #tpu.memory_space<vmem>>, vector<5x8x128xbf16>
    tpu.vector_store %arg12[%c0_35, %c0_36, %c768], %35 {strides = array<i32>} : memref<5x8x1152xbf16, #tpu.memory_space<vmem>>, vector<5x8x128xbf16>,
    %c2_i32_37 = arith.constant 2 : i32
    %37 = arith.addi %1, %c2_i32_37 : i32
    %c0_38 = arith.constant 0 : index
    %38 = arith.index_cast %37 : i32 to index
    %c1_39 = arith.constant 1 : index
    %c0_40 = arith.constant 0 : index
    %39 = vector.load %arg2[%c0_38, %38, %c1_39, %c0_40] : memref<1x11x10x128xbf16, #tpu.memory_space<vmem>>, vector<1x5x8x128xbf16>
    %40 = vector.shape_cast %39 : vector<1x5x8x128xbf16> to vector<5x8x128xbf16>
    %c0_41 = arith.constant 0 : index
    %c0_42 = arith.constant 0 : index
    %c896 = arith.constant 896 : index
    %41 = vector.load %arg12[%c0_41, %c0_42, %c896] : memref<5x8x1152xbf16, #tpu.memory_space<vmem>>, vector<5x8x128xbf16>
    tpu.vector_store %arg12[%c0_41, %c0_42, %c896], %40 {strides = array<i32>} : memref<5x8x1152xbf16, #tpu.memory_space<vmem>>, vector<5x8x128xbf16>,
    %c2_i32_43 = arith.constant 2 : i32
    %42 = arith.addi %1, %c2_i32_43 : i32
    %c0_44 = arith.constant 0 : index
    %43 = arith.index_cast %42 : i32 to index
    %c2_45 = arith.constant 2 : index
    %c0_46 = arith.constant 0 : index
    %44 = vector.load %arg2[%c0_44, %43, %c2_45, %c0_46] : memref<1x11x10x128xbf16, #tpu.memory_space<vmem>>, vector<1x5x8x128xbf16>
    %45 = vector.shape_cast %44 : vector<1x5x8x128xbf16> to vector<5x8x128xbf16>
    %c0_47 = arith.constant 0 : index
    %c0_48 = arith.constant 0 : index
    %c1024 = arith.constant 1024 : index
    %46 = vector.load %arg12[%c0_47, %c0_48, %c1024] : memref<5x8x1152xbf16, #tpu.memory_space<vmem>>, vector<5x8x128xbf16>
    tpu.vector_store %arg12[%c0_47, %c0_48, %c1024], %45 {strides = array<i32>} : memref<5x8x1152xbf16, #tpu.memory_space<vmem>>, vector<5x8x128xbf16>,
    %c0_49 = arith.constant 0 : index
    %c0_50 = arith.constant 0 : index
    %c0_51 = arith.constant 0 : index
    %47 = vector.load %arg12[%c0_49, %c0_50, %c0_51] : memref<5x8x1152xbf16, #tpu.memory_space<vmem>>, vector<5x8x1152xbf16>
    %48 = vector.shape_cast %47 : vector<5x8x1152xbf16> to vector<40x1152xbf16>
    %c0_52 = arith.constant 0 : index
    %c0_53 = arith.constant 0 : index
    %49 = vector.load %arg3[%c0_52, %c0_53] : memref<1152x128xbf16, #tpu.memory_space<vmem>>, vector<1152x128xbf16>
    %cst = arith.constant dense<0.000000e+00> : vector<40x128xf32>
    %50 = tpu.matmul %48, %49, %cst {dimension_numbers = #tpu.dot_dimension_numbers<[1], [0], [0], [1], [0, 0, 1, 1], [], []>} : vector<40x1152xbf16>, vector<1152x128xbf16>, vector<40x128xf32> -> vector<40x128xf32>
    %c0_54 = arith.constant 0 : index
    %c0_55 = arith.constant 0 : index
    %51 = vector.load %arg5[%c0_54, %c0_55] : memref<1x128xf32, #tpu.memory_space<vmem>>, vector<1x128xf32>
    %52 = vector.broadcast %51 : vector<1x128xf32> to vector<40x128xf32>
    %53 = arith.mulf %50, %52 : vector<40x128xf32>
    %c0_56 = arith.constant 0 : index
    %c0_57 = arith.constant 0 : index
    %54 = vector.load %arg6[%c0_56, %c0_57] : memref<1x128xf32, #tpu.memory_space<vmem>>, vector<1x128xf32>
    %55 = vector.broadcast %54 : vector<1x128xf32> to vector<40x128xf32>
    %56 = arith.addf %53, %55 : vector<40x128xf32>
    %cst_58 = arith.constant 0.000000e+00 : f32
    %57 = vector.broadcast %cst_58 : f32 to vector<40x128xf32>
    %58 = arith.maximumf %56, %57 : vector<40x128xf32>
    %c0_59 = arith.constant 0 : index
    %c0_60 = arith.constant 0 : index
    %59 = vector.load %arg7[%c0_59, %c0_60] : memref<1x128xf32, #tpu.memory_space<vmem>>, vector<1x128xf32>
    %60 = vector.broadcast %59 : vector<1x128xf32> to vector<40x128xf32>
    %61 = arith.mulf %58, %60 : vector<40x128xf32>
    %c0_61 = arith.constant 0 : index
    %c0_62 = arith.constant 0 : index
    %62 = vector.load %arg8[%c0_61, %c0_62] : memref<1x128xf32, #tpu.memory_space<vmem>>, vector<1x128xf32>
    %63 = vector.broadcast %62 : vector<1x128xf32> to vector<40x128xf32>
    %64 = arith.addf %61, %63 : vector<40x128xf32>
    %cst_63 = arith.constant 0.000000e+00 : f32
    %65 = vector.broadcast %cst_63 : f32 to vector<40x128xf32>
    %66 = arith.maximumf %64, %65 : vector<40x128xf32>
    %67 = vector.shape_cast %66 : vector<40x128xf32> to vector<5x8x128xf32>
    %68 = arith.truncf %67 : vector<5x8x128xf32> to vector<5x8x128xbf16>
    %c0_64 = arith.constant 0 : index
    %c0_65 = arith.constant 0 : index
    %c0_66 = arith.constant 0 : index
    %69 = vector.load %arg13[%c0_64, %c0_65, %c0_66] : memref<5x8x128xbf16, #tpu.memory_space<vmem>>, vector<5x8x128xbf16>
    tpu.vector_store %arg13[%c0_64, %c0_65, %c0_66], %68 {strides = array<i32>} : memref<5x8x128xbf16, #tpu.memory_space<vmem>>, vector<5x8x128xbf16>,
    %c0_67 = arith.constant 0 : index
    %c0_68 = arith.constant 0 : index
    %c0_69 = arith.constant 0 : index
    %70 = vector.load %arg13[%c0_67, %c0_68, %c0_69] : memref<5x8x128xbf16, #tpu.memory_space<vmem>>, vector<4x7x128xbf16>
    %c0_70 = arith.constant 0 : index
    %c0_71 = arith.constant 0 : index
    %c0_72 = arith.constant 0 : index
    %71 = vector.load %arg14[%c0_70, %c0_71, %c0_72] : memref<4x7x512xbf16, #tpu.memory_space<vmem>>, vector<4x7x128xbf16>
    tpu.vector_store %arg14[%c0_70, %c0_71, %c0_72], %70 {strides = array<i32>} : memref<4x7x512xbf16, #tpu.memory_space<vmem>>, vector<4x7x128xbf16>,
    %c0_73 = arith.constant 0 : index
    %c1_74 = arith.constant 1 : index
    %c0_75 = arith.constant 0 : index
    %72 = vector.load %arg13[%c0_73, %c1_74, %c0_75] : memref<5x8x128xbf16, #tpu.memory_space<vmem>>, vector<4x7x128xbf16>
    %c0_76 = arith.constant 0 : index
    %c0_77 = arith.constant 0 : index
    %c128_78 = arith.constant 128 : index
    %73 = vector.load %arg14[%c0_76, %c0_77, %c128_78] : memref<4x7x512xbf16, #tpu.memory_space<vmem>>, vector<4x7x128xbf16>
    tpu.vector_store %arg14[%c0_76, %c0_77, %c128_78], %72 {strides = array<i32>} : memref<4x7x512xbf16, #tpu.memory_space<vmem>>, vector<4x7x128xbf16>,
    %c1_79 = arith.constant 1 : index
    %c0_80 = arith.constant 0 : index
    %c0_81 = arith.constant 0 : index
    %74 = vector.load %arg13[%c1_79, %c0_80, %c0_81] : memref<5x8x128xbf16, #tpu.memory_space<vmem>>, vector<4x7x128xbf16>
    %c0_82 = arith.constant 0 : index
    %c0_83 = arith.constant 0 : index
    %c256_84 = arith.constant 256 : index
    %75 = vector.load %arg14[%c0_82, %c0_83, %c256_84] : memref<4x7x512xbf16, #tpu.memory_space<vmem>>, vector<4x7x128xbf16>
    tpu.vector_store %arg14[%c0_82, %c0_83, %c256_84], %74 {strides = array<i32>} : memref<4x7x512xbf16, #tpu.memory_space<vmem>>, vector<4x7x128xbf16>,
    %c1_85 = arith.constant 1 : index
    %c1_86 = arith.constant 1 : index
    %c0_87 = arith.constant 0 : index
    %76 = vector.load %arg13[%c1_85, %c1_86, %c0_87] : memref<5x8x128xbf16, #tpu.memory_space<vmem>>, vector<4x7x128xbf16>
    %c0_88 = arith.constant 0 : index
    %c0_89 = arith.constant 0 : index
    %c384_90 = arith.constant 384 : index
    %77 = vector.load %arg14[%c0_88, %c0_89, %c384_90] : memref<4x7x512xbf16, #tpu.memory_space<vmem>>, vector<4x7x128xbf16>
    tpu.vector_store %arg14[%c0_88, %c0_89, %c384_90], %76 {strides = array<i32>} : memref<4x7x512xbf16, #tpu.memory_space<vmem>>, vector<4x7x128xbf16>,
    %c0_91 = arith.constant 0 : index
    %c0_92 = arith.constant 0 : index
    %c0_93 = arith.constant 0 : index
    %78 = vector.load %arg14[%c0_91, %c0_92, %c0_93] : memref<4x7x512xbf16, #tpu.memory_space<vmem>>, vector<4x7x512xbf16>
    %79 = vector.shape_cast %78 : vector<4x7x512xbf16> to vector<28x512xbf16>
    %c0_94 = arith.constant 0 : index
    %c0_95 = arith.constant 0 : index
    %80 = vector.load %arg4[%c0_94, %c0_95] : memref<512x512xbf16, #tpu.memory_space<vmem>>, vector<512x512xbf16>
    %cst_96 = arith.constant dense<0.000000e+00> : vector<28x512xf32>
    %81 = tpu.matmul %79, %80, %cst_96 {dimension_numbers = #tpu.dot_dimension_numbers<[1], [0], [0], [1], [0, 0, 1, 1], [], []>} : vector<28x512xbf16>, vector<512x512xbf16>, vector<28x512xf32> -> vector<28x512xf32>
    %c0_97 = arith.constant 0 : index
    %c0_98 = arith.constant 0 : index
    %82 = vector.load %arg9[%c0_97, %c0_98] : memref<1x512xf32, #tpu.memory_space<vmem>>, vector<1x512xf32>
    %83 = vector.broadcast %82 : vector<1x512xf32> to vector<28x512xf32>
    %84 = arith.mulf %81, %83 : vector<28x512xf32>
    %c0_99 = arith.constant 0 : index
    %c0_100 = arith.constant 0 : index
    %85 = vector.load %arg10[%c0_99, %c0_100] : memref<1x512xf32, #tpu.memory_space<vmem>>, vector<1x512xf32>
    %86 = vector.broadcast %85 : vector<1x512xf32> to vector<28x512xf32>
    %87 = arith.addf %84, %86 : vector<28x512xf32>
    %cst_101 = arith.constant 0.000000e+00 : f32
    %88 = vector.broadcast %cst_101 : f32 to vector<28x512xf32>
    %89 = arith.maximumf %87, %88 : vector<28x512xf32>
    %90 = vector.shape_cast %89 : vector<28x512xf32> to vector<4x7x512xf32>
    %c0_102 = arith.constant 0 : index
    %c0_103 = arith.constant 0 : index
    %c0_104 = arith.constant 0 : index
    %c0_105 = arith.constant 0 : index
    %91 = vector.load %arg11[%c0_102, %c0_103, %c0_104, %c0_105] : memref<1x4x7x512xf32, #tpu.memory_space<vmem>>, vector<1x4x7x512xf32>
    %92 = vector.shape_cast %91 : vector<1x4x7x512xf32> to vector<4x7x512xf32>
    %93 = vector.shape_cast %90 : vector<4x7x512xf32> to vector<1x4x7x512xf32>
    tpu.vector_store %arg11[%c0_102, %c0_103, %c0_104, %c0_105], %93 {strides = array<i32>} : memref<1x4x7x512xf32, #tpu.memory_space<vmem>>, vector<1x4x7x512xf32>,
    return
  }
  func.func @transform_0(%arg0: i32, %arg1: i32) -> (i32, i32, i32, i32) {
    %c0_i32 = arith.constant 0 : i32
    %c0_i32_0 = arith.constant 0 : i32
    %c0_i32_1 = arith.constant 0 : i32
    %c0_i32_2 = arith.constant 0 : i32
    return %arg0, %c0_i32, %c0_i32_0, %c0_i32_1 : i32, i32, i32, i32
  }
  func.func @transform_1(%arg0: i32, %arg1: i32) -> (i32, i32) {
    %c0_i32 = arith.constant 0 : i32
    %c0_i32_0 = arith.constant 0 : i32
    %c0_i32_1 = arith.constant 0 : i32
    return %c0_i32, %c0_i32_0 : i32, i32
  }
  func.func @transform_2(%arg0: i32, %arg1: i32) -> (i32, i32) {
    %c0_i32 = arith.constant 0 : i32
    %c0_i32_0 = arith.constant 0 : i32
    %c0_i32_1 = arith.constant 0 : i32
    return %c0_i32, %c0_i32_0 : i32, i32
  }
  func.func @transform_3(%arg0: i32, %arg1: i32) -> (i32, i32) {
    %c0_i32 = arith.constant 0 : i32
    %c0_i32_0 = arith.constant 0 : i32
    %c0_i32_1 = arith.constant 0 : i32
    return %c0_i32, %c0_i32_0 : i32, i32
  }
  func.func @transform_4(%arg0: i32, %arg1: i32) -> (i32, i32) {
    %c0_i32 = arith.constant 0 : i32
    %c0_i32_0 = arith.constant 0 : i32
    %c0_i32_1 = arith.constant 0 : i32
    return %c0_i32, %c0_i32_0 : i32, i32
  }
  func.func @transform_5(%arg0: i32, %arg1: i32) -> (i32, i32) {
    %c0_i32 = arith.constant 0 : i32
    %c0_i32_0 = arith.constant 0 : i32
    %c0_i32_1 = arith.constant 0 : i32
    return %c0_i32, %c0_i32_0 : i32, i32
  }
  func.func @transform_6(%arg0: i32, %arg1: i32) -> (i32, i32) {
    %c0_i32 = arith.constant 0 : i32
    %c0_i32_0 = arith.constant 0 : i32
    %c0_i32_1 = arith.constant 0 : i32
    return %c0_i32, %c0_i32_0 : i32, i32
  }
  func.func @transform_7(%arg0: i32, %arg1: i32) -> (i32, i32) {
    %c0_i32 = arith.constant 0 : i32
    %c0_i32_0 = arith.constant 0 : i32
    %c0_i32_1 = arith.constant 0 : i32
    return %c0_i32, %c0_i32_0 : i32, i32
  }
  func.func @transform_8(%arg0: i32, %arg1: i32) -> (i32, i32) {
    %c0_i32 = arith.constant 0 : i32
    %c0_i32_0 = arith.constant 0 : i32
    %c0_i32_1 = arith.constant 0 : i32
    return %c0_i32, %c0_i32_0 : i32, i32
  }
  func.func @transform_9(%arg0: i32, %arg1: i32) -> (i32, i32, i32, i32) {
    %c0_i32 = arith.constant 0 : i32
    %c0_i32_0 = arith.constant 0 : i32
    %c0_i32_1 = arith.constant 0 : i32
    return %arg0, %arg1, %c0_i32, %c0_i32_0 : i32, i32, i32, i32
  }
}

</mosaic_0001>

<bundles_post_ra>
// kernel: decoder_block_inception_forward.1
= control target key start
LH: loop header
LB: loop body
LE: loop exit
PB: predicated region body
PF: predicated region fallthrough
CT: control target
= control target key end

     0   :  { %s5069_s30 = smov 0   ;;  %s5071_s10 = smov 0   ;;  %s6175_s0 = inlined_call_operand.vmem [shape: bf16[2,11,10,128], index: 0, kind: input, shape index: {}]   ;;  %s6176_s1 = inlined_call_operand.vmem [shape: bf16[1152,128], index: 1, kind: input, shape index: {}]   ;;  %s6177_s2 = inlined_call_operand.vmem [shape: bf16[512,512], index: 2, kind: input, shape index: {}]   ;;  %s6178_s3 = inlined_call_operand.vmem [shape: f32[1,128], index: 3, kind: input, shape index: {}]   ;;  %s6179_s4 = inlined_call_operand.vmem [shape: f32[1,128], index: 4, kind: input, shape index: {}]   ;;  %s6180_s5 = inlined_call_operand.vmem [shape: f32[1,128], index: 5, kind: input, shape index: {}]   ;;  %s6181_s6 = inlined_call_operand.vmem [shape: f32[1,128], index: 6, kind: input, shape index: {}]   ;;  %s6182_s7 = inlined_call_operand.vmem [shape: f32[1,512], index: 7, kind: input, shape index: {}]   ;;  %s6183_s8 = inlined_call_operand.vmem [shape: f32[1,512], index: 8, kind: input, shape index: {}]   ;;  %s6184_s9 = inlined_call_operand.vmem [shape: f32[2,8,7,512], index: 9, kind: output, shape index: {}]  }
   0x1   :  { %s5073_s11 = smov 0   ;;  %s5075_s12 = smov 0  }
   0x2   :  { %s5077_s13 = smov 0  }
   0x3 LB: > { %s28_s14 = sadd.s32 1, %s5006_s11  ;;  %s31_s15 = sadd.s32 1, %s5010_s12  ;;  %s5014_s13 = sphi %s5077_s13, %s19_s13   ;;  %s5010_s12 = sphi %s5075_s12, %s6195_s12   ;;  %s5006_s11 = sphi %s5073_s11, %s6194_s11   ;;  %s5002_s10 = sphi %s5071_s10, %s6193_s10   ;;  %s4998_s30 = sphi %s5069_s30, %s6192_s30  }
   0x4   : > { %p29_p0 = scmp.ge.s32.totalorder %s28_s14, 2  ;;  %p4098_p1 = scmp.ge.s32.totalorder %s5014_s13, 1 }
   0x5   : > { %p301_p2 = scmp.lt.s32.totalorder %s5014_s13, 5 }
   0x6   : > { %s6197_s14 = smov (%p29_p0, %s28_s14), 0  ;;  %s6199_s15 = smov (!%p29_p0, %s31_s15), %s5010_s12 }
   0x7   : > { %p302_p3 = pnand %p4098_p1, %p301_p2  ;;  %p33_p4 = scmp.ge.s32.totalorder %s6199_s15, 2 }
   0x8   : > { %v4678_v0 = vld [vmem:[%s6176_s1 + $0x40] sm:$0xff] (!%p302_p3)   ;;  %v4682_v4 = vld [vmem:[%s6176_s1 + $0x48] sm:$0xff] (!%p302_p3)   ;;  %v4686_v8 = vld [vmem:[%s6176_s1 + $0x50] sm:$0xff] (!%p302_p3)   ;;  %p342_p5 = scmp.lt.s32.totalorder (!%p302_p3), %s5002_s10, 1  ;;  %s4429_s18 = sshll.u32 (!%p302_p3), %s4998_s30, 5  ;;  %vm486_vm0 = vcmask (!%p302_p3), 1042432  }
   0x9   : > { %s6201_s15 = smov (%p33_p4, %s6199_s15), 0  ;;  %305 = sbr.rel (%p302_p3) target bundleno = 738 (0x2e2), region = 56 }
   0xa   : > { %v4679_v1 = vld [vmem:[%s6176_s1 + $0xc0] sm:$0xff] (!%p302_p3)   ;;  %4443 = vmatprep.subr.bf16.mxu0 (!%p302_p3), %v4678_v0  ;;  %v4683_v5 = vld [vmem:[%s6176_s1 + $0xc8] sm:$0xff] (!%p302_p3)   ;;  %v4687_v9 = vld [vmem:[%s6176_s1 + $0xd0] sm:$0xff] (!%p302_p3)   ;;  %vm487_vm1 = vcmask (!%p302_p3), 1046532   ;;  %vm383_vm2 = vsmask.f32 (!%p302_p3), 3328 }
   0xb   : > { %v4680_v2 = vld [vmem:[%s6176_s1] sm:$0xff] (!%p302_p3)   ;;  %4477 = vmatprep.subr.bf16.mxu1 (!%p302_p3), %v4679_v1  ;;  %v4684_v6 = vld [vmem:[%s6176_s1 + $0x8] sm:$0xff] (!%p302_p3)   ;;  %v4688_v10 = vld [vmem:[%s6176_s1 + $0x10] sm:$0xff] (!%p302_p3)   ;;  %vm384_vm3 = vsmask.f32 (!%p302_p3), 7440  ;;  %vm5017_vm6 = vmmov (!%p302_p3), 0  }
   0xc   : > { %v4681_v3 = vld [vmem:[%s6176_s1 + $0x80] sm:$0xff] (!%p302_p3)   ;;  %4444 = vmatpush3.bf16.msra.mxu0 (!%p302_p3), %v4680_v2  ;;  %v4685_v7 = vld [vmem:[%s6176_s1 + $0x88] sm:$0xff] (!%p302_p3)   ;;  %v4689_v11 = vld [vmem:[%s6176_s1 + $0x90] sm:$0xff] (!%p302_p3)   ;;  %vm1904_vm7 = vcmask (!%p302_p3), 1043456   ;;  %s4100_s19 = sshll.u32 (!%p302_p3), %s4998_s30, 2 }
   0xd   : > { %4478 = vmatpush3.bf16.msra.mxu1 (!%p302_p3), %v4681_v3  ;;  %4445 = vmatprep.subr.bf16.mxu0 (!%p302_p3), %v4682_v4  ;;  %v4690_v12 = vld [vmem:[%s6176_s1 + $0x58] sm:$0xff] (!%p302_p3)   ;;  %v4694_v16 = vld [vmem:[%s6176_s1 + $0x60] sm:$0xff] (!%p302_p3)   ;;  %v4698_v20 = vld [vmem:[%s6176_s1 + $0x68] sm:$0xff] (!%p302_p3)   ;;  %p6019_p6 = scmp.lt.s32.totalorder (!%p302_p3), %s4100_s19, 7 }
   0xe   : > { %4479 = vmatprep.subr.bf16.mxu1 (!%p302_p3), %v4683_v5  ;;  %v4691_v13 = vld [vmem:[%s6176_s1 + $0xd8] sm:$0xff] (!%p302_p3)   ;;  %v4695_v17 = vld [vmem:[%s6176_s1 + $0xe0] sm:$0xff] (!%p302_p3)   ;;  %v4699_v21 = vld [vmem:[%s6176_s1 + $0xe8] sm:$0xff] (!%p302_p3)  }
   0xf   : > { %v4692_v14 = vld [vmem:[%s6176_s1 + $0x18] sm:$0xff] (!%p302_p3)   ;;  %v4696_v18 = vld [vmem:[%s6176_s1 + $0x20] sm:$0xff] (!%p302_p3)   ;;  %v4700_v22 = vld [vmem:[%s6176_s1 + $0x28] sm:$0xff] (!%p302_p3)  }
  0x10   : > { %4446 = vmatpush3.bf16.msra.mxu0 %v4684_v6  ;;  %v4693_v15 = vld [vmem:[%s6176_s1 + $0x98] sm:$0xff]   ;;  %s6203_s10 = smov (!%p342_p5, %s5002_s10), 1  ;;  %v4697_v19 = vld [vmem:[%s6176_s1 + $0xa0] sm:$0xff]   ;;  %v4701_v23 = vld [vmem:[%s6176_s1 + $0xa8] sm:$0xff]   ;;  %s6205_s19 = smov (!%p6019_p6, %s4100_s19), 7 }
  0x11   : > { %4480 = vmatpush3.bf16.msra.mxu1 %v4685_v7  ;;  %4447 = vmatprep.subr.bf16.mxu0 %v4686_v8  ;;  %s4634_s20 = smul.u32 88, %s6203_s10  ;;  %v4702_v24 = vld [vmem:[%s6176_s1 + $0x70] sm:$0xff]   ;;  %v4706_v28 = vld [vmem:[%s6176_s1 + $0x78] sm:$0xff]   ;;  %vm5222_vm4 = vmor %vm486_vm0, %vm487_vm1  ;;  %s4101_s30 = sshll.u32 %s6205_s19, 2 }
  0x12   : > { %4481 = vmatprep.subr.bf16.mxu1 %v4687_v9  ;;  %v4703_v25 = vld [vmem:[%s6176_s1 + $0xf0] sm:$0xff]   ;;  %v4707_v29 = vld [vmem:[%s6176_s1 + $0xf8] sm:$0xff]   ;;  %v4716_v59 = vld [vmem:[%s6176_s1 + $0x140] sm:$0xff]   ;;  %s4102_s22 = sshll.u32 %s6203_s10, 5 }
  0x13   : > { %v4704_v26 = vld [vmem:[%s6176_s1 + $0x30] sm:$0xff]   ;;  %s346_s17 = scalar_lea.vmem %s6175_s0, %s4634_s20  ;;  %v4708_v30 = vld [vmem:[%s6176_s1 + $0x38] sm:$0xff]   ;;  %vm5232_vm5 = vmor %vm383_vm2, %vm384_vm3  ;;  %s354_s23 = sadd.s32 %s4102_s22, %s4101_s30 }
  0x14   : > { %4448 = vmatpush3.bf16.msra.mxu0 %v4688_v10  ;;  %v4705_v27 = vld [vmem:[%s6176_s1 + $0xb0] sm:$0xff]   ;;  %s5202_s26 = scalar_lea.vmem %s346_s17, %s4429_s18  ;;  %v4709_v31 = vld [vmem:[%s6176_s1 + $0xb8] sm:$0xff]   ;;  %v4718_v3 = vld [vmem:[%s6176_s1 + $0x1c0] sm:$0xff]   ;;  %s4103_s10 = sshll.u32 %s354_s23, 3 }
  0x15   : > { %4482 = vmatpush3.bf16.msra.mxu1 %v4689_v11  ;;  %4449 = vmatprep.subr.bf16.mxu0 %v4690_v12  ;;  %v363_v32 = vld [vmem:[%s5202_s26] sm:$0xf]  ;;  %v364_v33 = vld [vmem:[%s5202_s26 + $0x8] sm:$0xf]  ;;  %v374_v35 = vld [vmem:[%s5202_s26 + $0x4] sm:$0x1]  ;;  %s6086_s20 = scalar_lea.vmem %s6184_s9, %s4103_s10 }
  0x16   : > { %4483 = vmatprep.subr.bf16.mxu1 %v4691_v13  ;;  %v373_v34 = vld [vmem:[%s5202_s26] sm:$0xf]  ;;  %368 = vst [vmem:[#allocation2] sm:$0xf] %v363_v32  ;;  %369 = vst [vmem:[#allocation2 + $0x24] sm:$0xf] %v364_v33 }
  0x17   : > { %v375_v36 = vld [vmem:[%s5202_s26 + $0x8] sm:$0xf]  ;;  %v376_v37 = vld [vmem:[%s5202_s26 + $0xc] sm:$0x1]  ;;  %v387_v38 = vshrl.u32 %v373_v34, 16  ;;  %v390_v39 = vshll.u32 %v373_v34, 16  ;;  %vm5708_vm8 = vmand %vm1904_vm7, %vm383_vm2 }
  0x18   : > { %4450 = vmatpush3.bf16.msra.mxu0 %v4692_v14  ;;  %v396_v40 = vshll.u32 %v374_v35, 16  ;;  %v401_v41 = vshrl.u32 %v375_v36, 16  ;;  %v404_v42 = vshll.u32 %v375_v36, 16  ;;  %v410_v43 = vshll.u32 %v376_v37, 16  ;;  %v466_v44 = vld [vmem:[%s5202_s26] sm:$0xe] }
  0x19   : > { %4484 = vmatpush3.bf16.msra.mxu1 %v4693_v15  ;;  %4451 = vmatprep.subr.bf16.mxu0 %v4694_v16  ;;  %v389_v45 = vrot.slane %v387_v38, 4  ;;  %v392_v46 = vrot.slane %v390_v39, 5  ;;  %v467_v47 = vld [vmem:[%s5202_s26 + $0x4] sm:$0x1]  ;;  %v468_v48 = vld [vmem:[%s5202_s26 + $0x8] sm:$0xe] }
  0x1a   : > { %4485 = vmatprep.subr.bf16.mxu1 %v4695_v17  ;;  %v398_v49 = vrot.slane %v396_v40, 5  ;;  %v403_v50 = vrot.slane %v401_v41, 4  ;;  %v406_v51 = vrot.slane %v404_v42, 5  ;;  %v469_v52 = vld [vmem:[%s5202_s26 + $0xc] sm:$0x1]  ;;  %v4107_v55 = vrot.slane %v466_v44, 9 }
  0x1b   : > { %v393_v54 = vor.u32 %v392_v46, %v389_v45  ;;  %v491_v56 = vrot.slane %v467_v47, 5  ;;  %v4108_v57 = vrot.slane %v468_v48, 9  ;;  %v4114_v58 = vld [vmem:[%s5202_s26 + $0x8] sm:$0xf]  ;;  %v412_v62 = vrot.slane %v410_v43, 5  ;;  %v4719_v8 = vld [vmem:[%s6176_s1 + $0x180] sm:$0xff]  }
  0x1c   : > { %4452 = vmatpush3.bf16.msra.mxu0 %v4696_v18  ;;  %v407_v61 = vor.u32 %v406_v51, %v403_v50  ;;  %v495_v63 = vrot.slane %v469_v52, 5  ;;  %v4115_v0 = vld [vmem:[%s5202_s26 + $0x10] sm:$0xf]  ;;  %528 = vst [vmem:[#allocation2 + $0xc] sm:$0xf] %v4114_v58  ;;  %v4717_v11 = vld [vmem:[%s6176_s1 + $0x100] sm:$0xff]  }
  0x1d   : > { %4486 = vmatpush3.bf16.msra.mxu1 %v4697_v19  ;;  %4453 = vmatprep.subr.bf16.mxu0 %v4698_v20  ;;  %v394_v1 = vrot.slane %v393_v54, 4  ;;  %v492_v2 = vsel %vm5222_vm4, %v4107_v55, %v491_v56  ;;  %529 = vst [vmem:[#allocation2 + $0x30] sm:$0xf] %v4115_v0  ;;  %v4722_v12 = vld [vmem:[%s6176_s1 + $0x1c8] sm:$0xff]   ;;  %v4710_v13 = vld [vmem:[#allocation2] ss:$36 sps:$4 sm:$0xff]  }
  0x1e   : > { %4487 = vmatprep.subr.bf16.mxu1 %v4699_v21  ;;  %v408_v4 = vrot.slane %v407_v61, 4  ;;  %v496_v5 = vsel %vm5222_vm4, %v4108_v57, %v495_v63  ;;  %514 = vst [vmem:[#allocation2 + $0x8] sm:$0xf] %v492_v2  ;;  %v4720_v15 = vld [vmem:[%s6176_s1 + $0x148] sm:$0xff]   ;;  %v4724_v18 = vld [vmem:[%s6176_s1 + $0x150] sm:$0xff]   ;;  %v4728_v44 = vld [vmem:[%s6176_s1 + $0x158] sm:$0xff]  }
  0x1f   : > { %v399_v6 = vsel %vm5232_vm5, %v394_v1, %v398_v49  ;;  %515 = vst [vmem:[#allocation2 + $0x2c] sm:$0xf] %v496_v5  ;;  %v4721_v16 = vld [vmem:[%s6176_s1 + $0x108] sm:$0xff]   ;;  %v4726_v19 = vld [vmem:[%s6176_s1 + $0x1d0] sm:$0xff]   ;;  %v472_v38 = vld [vmem:[%s5202_s26 + $0x18] sm:$0xe] }
  0x20   : > { %4454 = vmatpush3.bf16.msra.mxu0 %v4700_v22  ;;  %v413_v7 = vsel %vm5232_vm5, %v408_v4, %v412_v62  ;;  %461 = vst [vmem:[#allocation2 + $0x4] sm:$0xf] %v399_v6  ;;  %v4723_v17 = vld [vmem:[%s6176_s1 + $0x188] sm:$0xff]   ;;  %v365_v20 = vld [vmem:[%s5202_s26 + $0x10] sm:$0xf]  ;;  %v4110_v48 = vrot.slane %v472_v38, 9 }
  0x21   : > { %4488 = vmatpush3.bf16.msra.mxu1 %v4701_v23  ;;  %4455 = vmatprep.subr.bf16.mxu0 %v4702_v24  ;;  %462 = vst [vmem:[#allocation2 + $0x28] sm:$0xf] %v413_v7  ;;  %v4727_v21 = vld [vmem:[%s6176_s1 + $0x190] sm:$0xff]   ;;  %v366_v22 = vld [vmem:[%s5202_s26 + $0x18] sm:$0xf]  ;;  %v4737_v62 = vld [vmem:[%s6176_s1 + $0x160] sm:$0xff]  }
  0x22   : > { %4489 = vmatprep.subr.bf16.mxu1 %v4703_v25  ;;  %370 = vst [vmem:[#allocation2 + $0x48] sm:$0xf] %v365_v20  ;;  %v377_v23 = vld [vmem:[%s5202_s26 + $0x10] sm:$0xf]  ;;  %v378_v24 = vld [vmem:[%s5202_s26 + $0x14] sm:$0x1] }
  0x23   : > { %371 = vst [vmem:[#allocation2 + $0x6c] sm:$0xf] %v366_v22  ;;  %v379_v25 = vld [vmem:[%s5202_s26 + $0x18] sm:$0xf]  ;;  %v470_v34 = vld [vmem:[%s5202_s26 + $0x10] sm:$0xe] }
  0x24   : > { %4456 = vmatpush3.bf16.msra.mxu0 %v4704_v26  ;;  %v4715_v10 = vld [vmem:[#allocation2 + $0xc] ss:$36 sps:$4 sm:$0xff]   ;;  %v380_v26 = vld [vmem:[%s5202_s26 + $0x1c] sm:$0x1]  ;;  %v432_v32 = vshll.u32 %v379_v25, 16  ;;  %v4109_v46 = vrot.slane %v470_v34, 9 }
  0x25   : > { %4490 = vmatpush3.bf16.msra.mxu1 %v4705_v27  ;;  %4457 = vmatprep.subr.bf16.mxu0 %v4706_v28  ;;  %v415_v27 = vshrl.u32 %v377_v23, 16  ;;  %v418_v28 = vshll.u32 %v377_v23, 16  ;;  %v438_v33 = vshll.u32 %v380_v26, 16  ;;  %v471_v37 = vld [vmem:[%s5202_s26 + $0x14] sm:$0x1]  ;;  %v4733_v54 = vld [vmem:[%s6176_s1 + $0x118] sm:$0xff]  }
  0x26   : > { %4491 = vmatprep.subr.bf16.mxu1 %v4707_v29  ;;  %v4713_v9 = vld [vmem:[#allocation2 + $0x8] ss:$36 sps:$4 sm:$0xff]   ;;  %1640 = vmatprep.mubr.bf16.mxu1 %v4715_v10  ;;  %v4725_v29 = vld [vmem:[%s6176_s1 + $0x110] sm:$0xff]   ;;  %v434_v41 = vrot.slane %v432_v32, 5  ;;  %v473_v43 = vld [vmem:[%s5202_s26 + $0x1c] sm:$0x1] }
  0x27   : > { %v417_v35 = vrot.slane %v415_v27, 4  ;;  %v420_v36 = vrot.slane %v418_v28, 5  ;;  %v440_v42 = vrot.slane %v438_v33, 5  ;;  %v499_v47 = vrot.slane %v471_v37, 5  ;;  %v4116_v49 = vld [vmem:[%s5202_s26 + $0x18] sm:$0xf] }
  0x28   : > { %4458 = vmatpush3.bf16.msra.mxu0 %v4708_v30  ;;  %v4712_v14 = vld [vmem:[#allocation2 + $0x4] ss:$36 sps:$4 sm:$0xff]   ;;  %v424_v30 = vshll.u32 %v378_v24, 16  ;;  %v503_v51 = vrot.slane %v473_v43, 5  ;;  %v4117_v52 = vld [vmem:[%s5202_s26 + $0x20] sm:$0xf] }
  0x29   : > { %4492 = vmatpush3.bf16.msra.mxu1 %v4709_v31  ;;  %4511 = vmatprep.subr.bf16.mxu0 %v4716_v59  ;;  %v429_v31 = vshrl.u32 %v379_v25, 16  ;;  %v421_v45 = vor.u32 %v420_v36, %v417_v35  ;;  %530 = vst [vmem:[#allocation2 + $0x54] sm:$0xf] %v4116_v49  ;;  %v4735_v55 = vld [vmem:[%s6176_s1 + $0x1d8] sm:$0xff]   ;;  %v500_v57 = vsel %vm5222_vm4, %v4109_v46, %v499_v47  ;;  %531 = vst [vmem:[#allocation2 + $0x78] sm:$0xf] %v4117_v52 }
  0x2a   : > { %4545 = vmatprep.subr.bf16.mxu1 %v4718_v3  ;;  %1584 = vmatprep.mubr.bf16.mxu0 %v4712_v14  ;;  %v426_v39 = vrot.slane %v424_v30, 5  ;;  %v4736_v58 = vld [vmem:[%s6176_s1 + $0x198] sm:$0xff]   ;;  %v504_v61 = vsel %vm5222_vm4, %v4110_v48, %v503_v51  ;;  %516 = vst [vmem:[#allocation2 + $0x50] sm:$0xf] %v500_v57  ;;  %v4738_v1 = vld [vmem:[%s6176_s1 + $0x120] sm:$0xff]   ;;  %v4741_v4 = vld [vmem:[%s6176_s1 + $0x168] sm:$0xff]  }
  0x2b   : > { %1585 = vmatmul.mubr.bf16.vlgmr.msra.gmra.mrb[0].mxu0 %v4710_v13  ;;  %v431_v40 = vrot.slane %v429_v31, 4  ;;  %v422_v56 = vrot.slane %v421_v45, 4  ;;  %517 = vst [vmem:[#allocation2 + $0x74] sm:$0xf] %v504_v61  ;;  %v4739_v2 = vld [vmem:[%s6176_s1 + $0x1e0] sm:$0xff]   ;;  %v4745_v22 = vld [vmem:[%s6176_s1 + $0x1e8] sm:$0xff]  }
  0x2c   : > { %1641 = vmatmul.mubr.bf16.vlgmr.msra.gmra.mrb[0].mxu1 %v4713_v9  ;;  %4512 = vmatpush3.bf16.msra.mxu0 %v4717_v11  ;;  %v4740_v3 = vld [vmem:[%s6176_s1 + $0x1a0] sm:$0xff]   ;;  %v4118_v25 = vld [vmem:[%s5202_s26 + $0x28] sm:$0xf]  ;;  %v4749_v32 = vld [vmem:[%s6176_s1 + $0x170] sm:$0xff]   ;;  %v5016_v51 = vmov 0.0  }
  0x2d   : > { %4546 = vmatpush3.bf16.msra.mxu1 %v4719_v8  ;;  %4513 = vmatprep.subr.bf16.mxu0 %v4720_v15  ;;  %v435_v50 = vor.u32 %v434_v41, %v431_v40  ;;  %v427_v63 = vsel %vm5232_vm5, %v422_v56, %v426_v39  ;;  %v367_v5 = vld [vmem:[%s5202_s26 + $0x20] sm:$0xf]  ;;  %v382_v7 = vld [vmem:[%s5202_s26 + $0x24] sm:$0x1]  ;;  %532 = vst [vmem:[#allocation2 + $0x9c] sm:$0xf] %v4118_v25 }
  0x2e   : > { %4547 = vmatprep.subr.bf16.mxu1 %v4722_v12  ;;  %463 = vst [vmem:[#allocation2 + $0x4c] sm:$0xf] %v427_v63  ;;  %v381_v6 = vld [vmem:[%s5202_s26 + $0x20] sm:$0xf]  ;;  %372 = vst [vmem:[#allocation2 + $0x90] sm:$0xf] %v367_v5 }
  0x2f   : > { %v436_v59 = vrot.slane %v435_v50, 4  ;;  %v443_v8 = vshrl.u32 %v381_v6, 16  ;;  %v446_v9 = vshll.u32 %v381_v6, 16  ;;  %v452_v10 = vshll.u32 %v382_v7, 16  ;;  %v474_v23 = vld [vmem:[%s5202_s26 + $0x20] sm:$0xe] }
  0x30   : > { %4514 = vmatpush3.bf16.msra.mxu0 %v4721_v16  ;;  %v4731_v11 = vld [vmem:[#allocation2 + $0x54] ss:$36 sps:$4 sm:$0xff]   ;;  %v475_v24 = vld [vmem:[%s5202_s26 + $0x24] sm:$0x1]  ;;  %v4111_v27 = vrot.slane %v474_v23, 9 }
  0x31   : > { %4548 = vmatpush3.bf16.msra.mxu1 %v4723_v17  ;;  %4515 = vmatprep.subr.bf16.mxu0 %v4724_v18  ;;  %v441_v0 = vsel %vm5232_vm5, %v436_v59, %v440_v42  ;;  %v445_v14 = vrot.slane %v443_v8, 4  ;;  %v448_v15 = vrot.slane %v446_v9, 5  ;;  %v4743_v18 = vld [vmem:[%s6176_s1 + $0x128] sm:$0xff]   ;;  %v507_v28 = vrot.slane %v475_v24, 5  ;;  %v4750_v33 = vld [vmem:[%s6176_s1 + $0x130] sm:$0xff]   ;;  %v4753_v36 = vld [vmem:[%s6176_s1 + $0x178] sm:$0xff]  }
  0x32   : > { %4549 = vmatprep.subr.bf16.mxu1 %v4726_v19  ;;  %464 = vst [vmem:[#allocation2 + $0x70] sm:$0xf] %v441_v0  ;;  %v4734_v12 = vld [vmem:[#allocation2 + $0x50] ss:$36 sps:$4 sm:$0xff]   ;;  %1648 = vmatprep.mubr.bf16.mxu1 %v4731_v11  ;;  %v4754_v37 = vld [vmem:[%s6176_s1 + $0x138] sm:$0xff]  }
  0x33   : > { %v449_v20 = vor.u32 %v448_v15, %v445_v14  ;;  %v508_v31 = vsel %vm5222_vm4, %v4111_v27, %v507_v28  ;;  %v4751_v34 = vld [vmem:[%s6176_s1 + $0x1f0] sm:$0xff]   ;;  %v4755_v38 = vld [vmem:[%s6176_s1 + $0x1f8] sm:$0xff]   ;;  %v4119_v39 = vld [vmem:[%s5202_s26 + $0x8] sm:$0xf] }
  0x34   : > { %4516 = vmatpush3.bf16.msra.mxu0 %v4725_v29  ;;  %1649 = vmatmul.mubr.bf16.gmra.mrb[4].mxu1 %v4734_v12  ;;  %v4747_v29 = vld [vmem:[%s6176_s1 + $0x1a8] sm:$0xff]   ;;  %518 = vst [vmem:[#allocation2 + $0x98] sm:$0xf] %v508_v31  ;;  %v4752_v35 = vld [vmem:[%s6176_s1 + $0x1b0] sm:$0xff]   ;;  %v544_v43 = vshrl.u32 %v4119_v39, 16  ;;  %v4759_v9 = vld [vmem:[%s6176_s1 + $0x1b8] sm:$0xff]  }
  0x35   : > { %4550 = vmatpush3.bf16.msra.mxu1 %v4727_v21  ;;  %4517 = vmatprep.subr.bf16.mxu0 %v4728_v44  ;;  %v837_v13 = vld [vmem:[#allocation2 + $0x48] sm:$0xff]  ;;  %v454_v21 = vrot.slane %v452_v10, 5  ;;  %v450_v26 = vrot.slane %v449_v20, 4  ;;  %v4121_v41 = vld [vmem:[%s5202_s26 + $0x10] sm:$0xf]  ;;  %v547_v44 = vshll.u32 %v4119_v39, 16 }
  0x36   : > { %4551 = vmatprep.subr.bf16.mxu1 %v4735_v55  ;;  %v4120_v40 = vld [vmem:[%s5202_s26 + $0xc] sm:$0x1]  ;;  %v4122_v42 = vld [vmem:[%s5202_s26 + $0x14] sm:$0x1]  ;;  %v558_v48 = vshrl.u32 %v4121_v41, 16  ;;  %v561_v49 = vshll.u32 %v4121_v41, 16 }
  0x37   : > { %v455_v30 = vsel %vm5232_vm5, %v450_v26, %v454_v21  ;;  %v553_v47 = vshll.u32 %v4120_v40, 16  ;;  %v567_v50 = vshll.u32 %v4122_v42, 16  ;;  %v4129_v57 = vld [vmem:[%s5202_s26 + $0x8] sm:$0xe]  ;;  %v4131_v59 = vld [vmem:[%s5202_s26 + $0x10] sm:$0xe] }
  0x38   : > { %4518 = vmatpush3.bf16.msra.mxu0 %v4733_v54  ;;  %465 = vst [vmem:[#allocation2 + $0x94] sm:$0xf] %v455_v30  ;;  %v546_v61 = vrot.slane %v544_v43, 4  ;;  %v560_v63 = vrot.slane %v558_v48, 4  ;;  %v4132_v0 = vld [vmem:[%s5202_s26 + $0x14] sm:$0x1] }
  0x39   : > { %4552 = vmatpush3.bf16.msra.mxu1 %v4736_v58  ;;  %4519 = vmatprep.subr.bf16.mxu0 %v4737_v62  ;;  %v842_v16 = vld [vmem:[#allocation2 + $0x6c] sm:$0xff]  ;;  %v549_v62 = vrot.slane %v547_v44, 5  ;;  %v569_v6 = vrot.slane %v567_v50, 5  ;;  %v4140_v7 = vrot.slane %v4131_v59, 9  ;;  %v649_v8 = vrot.slane %v4132_v0, 5 }
  0x3a   : > { %4553 = vmatprep.subr.bf16.mxu1 %v4739_v2  ;;  %v4729_v17 = vld [vmem:[#allocation2 + $0x4c] ss:$36 sps:$4 sm:$0xff]   ;;  %v4185_v19 = vcombine.low %v837_v13, %v842_v16  ;;  %v563_v2 = vrot.slane %v561_v49, 5  ;;  %v4147_v13 = vld [vmem:[%s5202_s26 + $0x18] sm:$0xf] }
  0x3b   : > { %1592 = vmatprep.mubr.bf16.mxu0 %v4729_v17  ;;  %v848_v46 = vld [vmem:[#allocation2 + $0x98] sm:$0xff]  ;;  %v4130_v58 = vld [vmem:[%s5202_s26 + $0xc] sm:$0x1]  ;;  %v550_v5 = vor.u32 %v549_v62, %v546_v61  ;;  %v4146_v12 = vld [vmem:[%s5202_s26 + $0x10] sm:$0xf]  ;;  %v650_v16 = vsel %vm5222_vm4, %v4140_v7, %v649_v8 }
  0x3c   : > { %4520 = vmatpush3.bf16.msra.mxu0 %v4738_v1  ;;  %v4197_v55 = vcombine.high %v848_v46, %v848_v46  ;;  %v4196_v56 = vcombine.low %v848_v46, %v848_v46  ;;  %v555_v1 = vrot.slane %v553_v47, 5  ;;  %v564_v10 = vor.u32 %v563_v2, %v560_v63  ;;  %v4151_v14 = vld [vmem:[%s5202_s26 + $0x10] sm:$0xf]  ;;  %682 = vst [vmem:[#allocation2 + $0x18] sm:$0xf] %v4146_v12  ;;  %v4763_v63 = vld [vmem:[%s6176_s1 + $0x200] sm:$0xff]  }
  0x3d   : > { %4554 = vmatpush3.bf16.msra.mxu1 %v4740_v3  ;;  %4521 = vmatprep.subr.bf16.mxu0 %v4741_v4  ;;  %v4139_v3 = vrot.slane %v4129_v57, 9  ;;  %v645_v4 = vrot.slane %v4130_v58, 5  ;;  %v551_v15 = vrot.slane %v550_v5, 4  ;;  %683 = vst [vmem:[#allocation2 + $0x3c] sm:$0xf] %v4147_v13 }
  0x3e   : > { %1593 = vmatmul.mubr.bf16.gmra.mrb[4].mxu0 %v4185_v19  ;;  %4555 = vmatprep.subr.bf16.mxu1 %v4745_v22  ;;  %v4152_v17 = vld [vmem:[%s5202_s26 + $0x14] sm:$0x1]  ;;  %v698_v19 = vshrl.u32 %v4151_v14, 16  ;;  %v565_v20 = vrot.slane %v564_v10, 4  ;;  %669 = vst [vmem:[#allocation2 + $0x38] sm:$0xf] %v650_v16 }
  0x3f   : > { %v847_v45 = vld [vmem:[#allocation2 + $0x90] sm:$0xff]  ;;  %1656 = vmatprep.mubr.bf16.mxu1 %v4197_v55  ;;  %v646_v11 = vsel %vm5222_vm4, %v4139_v3, %v645_v4  ;;  %v4154_v21 = vld [vmem:[%s5202_s26 + $0x1c] sm:$0x1]  ;;  %v701_v22 = vshll.u32 %v4151_v14, 16  ;;  %v707_v23 = vshll.u32 %v4152_v17, 16  ;;  %v556_v25 = vsel %vm5232_vm5, %v551_v15, %v555_v1 }
  0x40   : > { %4522 = vmatpush3.bf16.msra.mxu0 %v4743_v18  ;;  %v4195_v52 = vcombine.high %v847_v45, %v847_v45  ;;  %v4194_v54 = vcombine.low %v847_v45, %v847_v45  ;;  %1657 = vmatmul.mubr.bf16.gmra.mrb[8].mxu1 %v4196_v56  ;;  %668 = vst [vmem:[#allocation2 + $0x14] sm:$0xf] %v646_v11  ;;  %v4153_v18 = vld [vmem:[%s5202_s26 + $0x18] sm:$0xf]  ;;  %v700_v26 = vrot.slane %v698_v19, 4  ;;  %v721_v28 = vshll.u32 %v4154_v21, 16 }
  0x41   : > { %4556 = vmatpush3.bf16.msra.mxu1 %v4747_v29  ;;  %4523 = vmatprep.subr.bf16.mxu0 %v4749_v32  ;;  %v712_v24 = vshrl.u32 %v4153_v18, 16  ;;  %v715_v27 = vshll.u32 %v4153_v18, 16  ;;  %v570_v29 = vsel %vm5232_vm5, %v565_v20, %v569_v6  ;;  %618 = vst [vmem:[#allocation2 + $0x10] sm:$0xf] %v556_v25  ;;  %v703_v30 = vrot.slane %v701_v22, 5  ;;  %v4764_v22 = vld [vmem:[%s6176_s1 + $0x208] sm:$0xff]  }
  0x42   : > { %4557 = vmatprep.subr.bf16.mxu1 %v4751_v34  ;;  %1600 = vmatprep.mubr.bf16.mxu0 %v4195_v52  ;;  %v709_v31 = vrot.slane %v707_v23, 5  ;;  %619 = vst [vmem:[#allocation2 + $0x34] sm:$0xf] %v570_v29  ;;  %v723_v34 = vrot.slane %v721_v28, 5  ;;  %v4126_v40 = vld [vmem:[%s5202_s26 + $0x24] sm:$0x1] }
  0x43   : > { %v714_v32 = vrot.slane %v712_v24, 4  ;;  %v595_v47 = vshll.u32 %v4126_v40, 16  ;;  %v4133_v48 = vld [vmem:[%s5202_s26 + $0x18] sm:$0xe]  ;;  %v4134_v55 = vld [vmem:[%s5202_s26 + $0x1c] sm:$0x1] }
  0x44   : > { %4524 = vmatpush3.bf16.msra.mxu0 %v4750_v33  ;;  %v717_v33 = vrot.slane %v715_v27, 5  ;;  %v4135_v61 = vld [vmem:[%s5202_s26 + $0x20] sm:$0xe]  ;;  %v4136_v1 = vld [vmem:[%s5202_s26 + $0x24] sm:$0x1]  ;;  %v4141_v2 = vrot.slane %v4133_v48, 9 }
  0x45   : > { %4558 = vmatpush3.bf16.msra.mxu1 %v4752_v35  ;;  %4525 = vmatprep.subr.bf16.mxu0 %v4753_v36  ;;  %v704_v35 = vor.u32 %v703_v30, %v700_v26  ;;  %v4123_v36 = vld [vmem:[%s5202_s26 + $0x18] sm:$0xf]  ;;  %v597_v59 = vrot.slane %v595_v47, 5  ;;  %v653_v3 = vrot.slane %v4134_v55, 5  ;;  %v4142_v7 = vrot.slane %v4135_v61, 9 }
  0x46   : > { %4559 = vmatprep.subr.bf16.mxu1 %v4755_v38  ;;  %1601 = vmatmul.mubr.bf16.gmra.mrb[8].mxu0 %v4194_v54  ;;  %v4125_v38 = vld [vmem:[%s5202_s26 + $0x20] sm:$0xf]  ;;  %v718_v39 = vor.u32 %v717_v33, %v714_v32  ;;  %v572_v41 = vshrl.u32 %v4123_v36, 16  ;;  %v575_v42 = vshll.u32 %v4123_v36, 16  ;;  %v657_v10 = vrot.slane %v4136_v1, 5  ;;  %v4770_v33 = vld [vmem:[%s6176_s1 + $0x210] sm:$0xff]  }
  0x47   : > { %v705_v44 = vrot.slane %v704_v35, 4  ;;  %v586_v45 = vshrl.u32 %v4125_v38, 16  ;;  %v589_v46 = vshll.u32 %v4125_v38, 16  ;;  %v4758_v5 = vld [vmem:[#allocation2 + $0x14] ss:$36 sps:$4 sm:$0xff]  }
  0x48   : > { %4526 = vmatpush3.bf16.msra.mxu0 %v4754_v37  ;;  %v4124_v37 = vld [vmem:[%s5202_s26 + $0x1c] sm:$0x1]  ;;  %v719_v49 = vrot.slane %v718_v39, 4  ;;  %v574_v50 = vrot.slane %v572_v41, 4  ;;  %v577_v52 = vrot.slane %v575_v42, 5  ;;  %1696 = vmatprep.mubr.bf16.mxu0 %v4758_v5  ;;  %v658_v17 = vsel %vm5222_vm4, %v4142_v7, %v657_v10  ;;  %v4776_v5 = vld [vmem:[%s6176_s1 + $0x220] sm:$0xff]  }
  0x49   : > { %4590 = vmatprep.subr.bf16.mxu0 %v5016_v51  ;;  %4560 = vmatpush3.bf16.msra.mxu1 %v4759_v9  ;;  %v581_v43 = vshll.u32 %v4124_v37, 16  ;;  %v710_v56 = vsel %vm5232_vm5, %v705_v44, %v709_v31  ;;  %v588_v57 = vrot.slane %v586_v45, 4  ;;  %v591_v58 = vrot.slane %v589_v46, 5  ;;  %v4756_v4 = vld [vmem:[#allocation2 + $0x10] ss:$36 sps:$4 sm:$0xff]   ;;  %v4772_v47 = vld [vmem:[%s6176_s1 + $0x218] sm:$0xff]  }
  0x4a   : > { %v724_v62 = vsel %vm5232_vm5, %v719_v49, %v723_v34  ;;  %772 = vst [vmem:[#allocation2 + $0x1c] sm:$0xf] %v710_v56  ;;  %v578_v0 = vor.u32 %v577_v52, %v574_v50  ;;  %v654_v9 = vsel %vm5222_vm4, %v4141_v2, %v653_v3  ;;  %v4148_v11 = vld [vmem:[%s5202_s26 + $0x20] sm:$0xf]  ;;  %v4149_v12 = vld [vmem:[%s5202_s26 + $0x28] sm:$0xf] }
  0x4b   : > { %v583_v54 = vrot.slane %v581_v43, 5  ;;  %773 = vst [vmem:[#allocation2 + $0x40] sm:$0xf] %v724_v62  ;;  %v592_v6 = vor.u32 %v591_v58, %v588_v57  ;;  %670 = vst [vmem:[#allocation2 + $0x5c] sm:$0xf] %v654_v9 }
  0x4c   : > { %v579_v8 = vrot.slane %v578_v0, 4  ;;  %684 = vst [vmem:[#allocation2 + $0x60] sm:$0xf] %v4148_v11  ;;  %685 = vst [vmem:[#allocation2 + $0x84] sm:$0xf] %v4149_v12 }
  0x4d   : > { %v593_v13 = vrot.slane %v592_v6, 4  ;;  %v4155_v14 = vld [vmem:[%s5202_s26 + $0x20] sm:$0xf]  ;;  %v4156_v15 = vld [vmem:[%s5202_s26 + $0x24] sm:$0x1] }
  0x4e   : > { %1697 = vmatmul.mubr.bf16.vlgmr.msra.gmra.mrb[12].mxu0 %v4756_v4  ;;  %v584_v16 = vsel %vm5232_vm5, %v579_v8, %v583_v54  ;;  %v4157_v18 = vld [vmem:[%s5202_s26 + $0x28] sm:$0xf]  ;;  %v4158_v19 = vld [vmem:[%s5202_s26 + $0x2c] sm:$0x1]  ;;  %v726_v20 = vshrl.u32 %v4155_v14, 16  ;;  %v729_v21 = vshll.u32 %v4155_v14, 16 }
  0x4f   : > { %4591 = vmatpush3.bf16.msra.mxu0 %v4763_v63  ;;  %v598_v23 = vsel %vm5232_vm5, %v593_v13, %v597_v59  ;;  %620 = vst [vmem:[#allocation2 + $0x58] sm:$0xf] %v584_v16  ;;  %671 = vst [vmem:[#allocation2 + $0x80] sm:$0xf] %v658_v17  ;;  %v735_v24 = vshll.u32 %v4156_v15, 16  ;;  %v740_v25 = vshrl.u32 %v4157_v18, 16 }
  0x50   : > { %v743_v26 = vshll.u32 %v4157_v18, 16  ;;  %4592 = vmatprep.subr.bf16.mxu0 %v5016_v51  ;;  %621 = vst [vmem:[#allocation2 + $0x7c] sm:$0xf] %v598_v23  ;;  %v728_v27 = vrot.slane %v726_v20, 4  ;;  %v731_v28 = vrot.slane %v729_v21, 5  ;;  %v749_v29 = vshll.u32 %v4158_v19, 16 }
  0x51   : > { %v737_v30 = vrot.slane %v735_v24, 5  ;;  %v742_v31 = vrot.slane %v740_v25, 4  ;;  %v4760_v34 = vld [vmem:[#allocation2 + $0x18] ss:$36 sps:$4 sm:$0xff]   ;;  %v4127_v39 = vld [vmem:[%s5202_s26 + $0x28] sm:$0xf] }
  0x52   : > { %v745_v32 = vrot.slane %v743_v26, 5  ;;  %v4762_v35 = vld [vmem:[#allocation2 + $0x1c] ss:$36 sps:$4 sm:$0xff]   ;;  %v732_v36 = vor.u32 %v731_v28, %v728_v27  ;;  %v751_v37 = vrot.slane %v749_v29, 5  ;;  %v4128_v40 = vld [vmem:[%s5202_s26 + $0x2c] sm:$0x1] }
  0x53   : > { %4593 = vmatpush3.bf16.msra.mxu0 %v4764_v22  ;;  %1752 = vmatprep.mubr.bf16.mxu1 %v4762_v35  ;;  %v600_v42 = vshrl.u32 %v4127_v39, 16  ;;  %v603_v43 = vshll.u32 %v4127_v39, 16  ;;  %v609_v44 = vshll.u32 %v4128_v40, 16  ;;  %v4137_v45 = vld [vmem:[%s5202_s26 + $0x28] sm:$0xe]  ;;  %v4779_v29 = vld [vmem:[%s6176_s1 + $0x230] sm:$0xff]  }
  0x54   : > { %v746_v38 = vor.u32 %v745_v32, %v742_v31  ;;  %4594 = vmatprep.subr.bf16.mxu0 %v5016_v51  ;;  %v733_v41 = vrot.slane %v732_v36, 4  ;;  %1753 = vmatmul.mubr.bf16.vlgmr.msra.gmra.mrb[12].mxu1 %v4760_v34  ;;  %v4138_v48 = vld [vmem:[%s5202_s26 + $0x2c] sm:$0x1]  ;;  %v4143_v49 = vrot.slane %v4137_v45, 9  ;;  %v4150_v50 = vld [vmem:[%s5202_s26 + $0x30] sm:$0xf] }
  0x55   : > { %v602_v54 = vrot.slane %v600_v42, 4  ;;  %v605_v55 = vrot.slane %v603_v43, 5  ;;  %v611_v56 = vrot.slane %v609_v44, 5  ;;  %686 = vst [vmem:[#allocation2 + $0xa8] sm:$0xf] %v4150_v50  ;;  %v661_v62 = vrot.slane %v4138_v48, 5 }
  0x56   : > { %v747_v46 = vrot.slane %v746_v38, 4  ;;  %v738_v52 = vsel %vm5232_vm5, %v733_v41, %v737_v30  ;;  %v4159_v57 = vld [vmem:[%s5202_s26 + $0x30] sm:$0xf]  ;;  %v4765_v58 = vld [vmem:[#allocation2 + $0x5c] ss:$36 sps:$4 sm:$0xff]   ;;  %v4778_v13 = vld [vmem:[%s6176_s1 + $0x228] sm:$0xff]  }
  0x57   : > { %v4767_v59 = vld [vmem:[#allocation2 + $0x58] ss:$36 sps:$4 sm:$0xff]   ;;  %774 = vst [vmem:[#allocation2 + $0x64] sm:$0xf] %v738_v52  ;;  %4595 = vmatpush3.bf16.msra.mxu0 %v4770_v33  ;;  %v606_v63 = vor.u32 %v605_v55, %v602_v54  ;;  %v4160_v0 = vld [vmem:[%s5202_s26 + $0x34] sm:$0x1]  ;;  %1704 = vmatprep.mubr.bf16.mxu0 %v4765_v58  ;;  %v662_v3 = vsel %vm5222_vm4, %v4143_v49, %v661_v62 }
  0x58   : > { %v752_v61 = vsel %vm5232_vm5, %v747_v46, %v751_v37  ;;  %4596 = vmatprep.subr.bf16.mxu0 %v5016_v51  ;;  %v754_v1 = vshrl.u32 %v4159_v57, 16  ;;  %v757_v2 = vshll.u32 %v4159_v57, 16  ;;  %v763_v4 = vshll.u32 %v4160_v0, 16  ;;  %1705 = vmatmul.mubr.bf16.gmra.mrb[16].mxu0 %v4767_v59  ;;  %672 = vst [vmem:[#allocation2 + $0xa4] sm:$0xf] %v662_v3  ;;  %v4780_v44 = vld [vmem:[%s6176_s1 + $0x238] sm:$0xff]  }
  0x59   : > { %775 = vst [vmem:[#allocation2 + $0x88] sm:$0xf] %v752_v61  ;;  %v607_v6 = vrot.slane %v606_v63, 4  ;;  %v4161_v12 = vld [vmem:[%s5202_s26 + $0x10] sm:$0xe] }
  0x5a   : > { %v756_v7 = vrot.slane %v754_v1, 4  ;;  %v759_v8 = vrot.slane %v757_v2, 5  ;;  %v765_v9 = vrot.slane %v763_v4, 5  ;;  %v4162_v14 = vld [vmem:[%s5202_s26 + $0x14] sm:$0x1]  ;;  %v4171_v18 = vrot.slane %v4161_v12, 9 }
  0x5b   : > { %4597 = vmatpush3.bf16.msra.mxu0 %v4772_v47  ;;  %v612_v10 = vsel %vm5232_vm5, %v607_v6, %v611_v56  ;;  %v4163_v15 = vld [vmem:[%s5202_s26 + $0x18] sm:$0xe]  ;;  %v4164_v16 = vld [vmem:[%s5202_s26 + $0x1c] sm:$0x1]  ;;  %v799_v19 = vrot.slane %v4162_v14, 5 }
  0x5c   : > { %4598 = vmatprep.subr.bf16.mxu0 %v5016_v51  ;;  %v760_v11 = vor.u32 %v759_v8, %v756_v7  ;;  %622 = vst [vmem:[#allocation2 + $0xa0] sm:$0xf] %v612_v10  ;;  %v4172_v20 = vrot.slane %v4163_v15, 9  ;;  %v4771_v22 = vld [vmem:[#allocation2 + $0x60] ss:$36 sps:$4 sm:$0xff]   ;;  %v803_v23 = vrot.slane %v4164_v16, 5 }
  0x5d   : > { %v800_v25 = vsel %vm5222_vm4, %v4171_v18, %v799_v19  ;;  %v4165_v26 = vld [vmem:[%s5202_s26 + $0x20] sm:$0xe]  ;;  %v4166_v27 = vld [vmem:[%s5202_s26 + $0x24] sm:$0x1]  ;;  %v4167_v28 = vld [vmem:[%s5202_s26 + $0x28] sm:$0xe] }
  0x5e   : > { %v761_v17 = vrot.slane %v760_v11, 4  ;;  %v804_v60 = vsel %vm5222_vm4, %v4172_v20, %v803_v23  ;;  %822 = vst [vmem:[#allocation2 + $0x20] sm:$0xf] %v800_v25  ;;  %v4168_v30 = vld [vmem:[%s5202_s26 + $0x2c] sm:$0x1]  ;;  %v4173_v31 = vrot.slane %v4165_v26, 9 }
  0x5f   : > { %4599 = vmatpush3.bf16.msra.mxu0 %v4776_v5  ;;  %v807_v32 = vrot.slane %v4166_v27, 5  ;;  %v4174_v33 = vrot.slane %v4167_v28, 9  ;;  %823 = vst [vmem:[#allocation2 + $0x44] sm:$0xf] %v804_v60  ;;  %v811_v34 = vrot.slane %v4168_v30, 5 }
  0x60   : > { %v4768_v21 = vld [vmem:[#allocation2 + $0x64] ss:$36 sps:$4 sm:$0xff]   ;;  %v766_v24 = vsel %vm5232_vm5, %v761_v17, %v765_v9  ;;  %4600 = vmatprep.subr.bf16.mxu0 %v5016_v51  ;;  %v4169_v35 = vld [vmem:[%s5202_s26 + $0x30] sm:$0xe]  ;;  %v4170_v36 = vld [vmem:[%s5202_s26 + $0x34] sm:$0x1] }
  0x61   : > { %1760 = vmatprep.mubr.bf16.mxu1 %v4768_v21  ;;  %776 = vst [vmem:[#allocation2 + $0xac] sm:$0xf] %v766_v24  ;;  %v808_v37 = vsel %vm5222_vm4, %v4173_v31, %v807_v32  ;;  %v4175_v38 = vrot.slane %v4169_v35, 9  ;;  %v815_v39 = vrot.slane %v4170_v36, 5  ;;  %v812_v41 = vsel %vm5222_vm4, %v4174_v33, %v811_v34  ;;  %v4786_v52 = vld [vmem:[%s6177_s2 + $0x4] ss:$16 sps:$4 sm:$0xff]  }
  0x62   : > { %1761 = vmatmul.mubr.bf16.gmra.mrb[16].mxu1 %v4771_v22  ;;  %824 = vst [vmem:[#allocation2 + $0x68] sm:$0xf] %v808_v37  ;;  %825 = vst [vmem:[#allocation2 + $0x8c] sm:$0xf] %v812_v41  ;;  %v4789_v54 = vld [vmem:[%s6177_s2 + $0xc] ss:$16 sps:$4 sm:$0xff]   ;;  %3136 = vmatprep.subr.bf16.mxu1 %v4786_v52 }
  0x63   : > { %4601 = vmatpush3.bf16.msra.mxu0 %v4778_v13  ;;  %v849_v40 = vld [vmem:[#allocation2 + $0xa0] sm:$0xff]  ;;  %v816_v45 = vsel %vm5222_vm4, %v4175_v38, %v815_v39  ;;  %v4787_v56 = vld [vmem:[%s6177_s2 + $0x8] ss:$16 sps:$4 sm:$0xff]   ;;  %v4795_v57 = vld [vmem:[%s6177_s2 + $0x2c] ss:$16 sps:$4 sm:$0xff]  }
  0x64   : > { %4602 = vmatprep.subr.bf16.mxu0 %v5016_v51  ;;  %v4199_v42 = vcombine.high %v849_v40, %v849_v40  ;;  %v4198_v43 = vcombine.low %v849_v40, %v849_v40  ;;  %826 = vst [vmem:[#allocation2 + $0xb0] sm:$0xf] %v816_v45  ;;  %v4784_v55 = vld [vmem:[%s6177_s2] ss:$16 sps:$4 sm:$0xff]   ;;  %v4793_v59 = vld [vmem:[%s6177_s2 + $0x28] ss:$16 sps:$4 sm:$0xff]  }
  0x65   : > { %3137 = vmatpush1.bf16.msra.mxu1 %v4784_v55  ;;  %v4790_v58 = vld [vmem:[%s6177_s2 + $0x20] ss:$16 sps:$4 sm:$0xff]   ;;  %v4798_v61 = vld [vmem:[%s6177_s2 + $0x44] ss:$16 sps:$4 sm:$0xff]   ;;  %v4801_v62 = vld [vmem:[%s6177_s2 + $0x4c] ss:$16 sps:$4 sm:$0xff]  }
  0x66   : > { %1712 = vmatprep.mubr.bf16.mxu0 %v4199_v42  ;;  %v4781_v49 = vld [vmem:[#allocation2 + $0x20] ss:$36 sps:$4 sm:$0xff]   ;;  %v4799_v0 = vld [vmem:[%s6177_s2 + $0x48] ss:$16 sps:$4 sm:$0xff]   ;;  %v4807_v2 = vld [vmem:[%s6177_s2 + $0x6c] ss:$16 sps:$4 sm:$0xff]  }
  0x67   : > { %4603 = vmatpush3.bf16.msra.mxu0 %v4779_v29  ;;  %v4796_v63 = vld [vmem:[%s6177_s2 + $0x40] ss:$16 sps:$4 sm:$0xff]   ;;  %v4804_v1 = vld [vmem:[%s6177_s2 + $0x64] ss:$16 sps:$4 sm:$0xff]   ;;  %v4805_v4 = vld [vmem:[%s6177_s2 + $0x68] ss:$16 sps:$4 sm:$0xff]  }
  0x68   : > { %1713 = vmatmul.mubr.bf16.gmra.mrb[20].mxu0 %v4198_v43  ;;  %v850_v46 = vld [vmem:[#allocation2 + $0xa8] sm:$0xff]  ;;  %4604 = vmatprep.subr.bf16.mxu0 %v5016_v51  ;;  %v4802_v3 = vld [vmem:[%s6177_s2 + $0x60] ss:$16 sps:$4 sm:$0xff]   ;;  %v4810_v5 = vld [vmem:[%s6177_s2 + $0x84] ss:$16 sps:$4 sm:$0xff]  }
  0x69   : > { %v4201_v47 = vcombine.high %v850_v46, %v850_v46  ;;  %v4200_v48 = vcombine.low %v850_v46, %v850_v46  ;;  %4606 = vmatprep.mubr.msk.bf16.mxu0 %vm5017_vm6, %v5016_v51  ;;  %v4782_v53 = vld [vmem:[#allocation2 + $0x68] ss:$36 sps:$4 sm:$0xff]   ;;  %v4808_v7 = vld [vmem:[%s6177_s2 + $0x80] ss:$16 sps:$4 sm:$0xff]   ;;  %v4816_v9 = vld [vmem:[%s6177_s2 + $0xa4] ss:$16 sps:$4 sm:$0xff]  }
  0x6a   : > { %v4813_v6 = vld [vmem:[%s6177_s2 + $0x8c] ss:$16 sps:$4 sm:$0xff]   ;;  %v4811_v8 = vld [vmem:[%s6177_s2 + $0x88] ss:$16 sps:$4 sm:$0xff]   ;;  %v4814_v11 = vld [vmem:[%s6177_s2 + $0xa0] ss:$16 sps:$4 sm:$0xff]  }
  0x6b   : > { %1768 = vmatprep.mubr.bf16.mxu1 %v4201_v47  ;;  %4605 = vmatpush3.bf16.msra.mxu0 %v4780_v44  ;;  %v4783_v50 = vld [vmem:[#allocation2 + $0xb0] ss:$0 sps:$4 sm:$0xff]   ;;  %v4819_v10 = vld [vmem:[%s6177_s2 + $0xac] ss:$16 sps:$4 sm:$0xff]   ;;  %v4817_v12 = vld [vmem:[%s6177_s2 + $0xa8] ss:$16 sps:$4 sm:$0xff]  }
  0x6c   : > { %1769 = vmatmul.mubr.bf16.gmra.mrb[20].mxu1 %v4200_v48  ;;  %3242 = vmatprep.subr.bf16.mxu0 %v4789_v54  ;;  %v4822_v14 = vld [vmem:[%s6177_s2 + $0xc4] ss:$16 sps:$4 sm:$0xff]   ;;  %v4825_v15 = vld [vmem:[%s6177_s2 + $0xcc] ss:$16 sps:$4 sm:$0xff]   ;;  %v4820_v17 = vld [vmem:[%s6177_s2 + $0xc0] ss:$16 sps:$4 sm:$0xff]  }
  0x6d   : > { %v4823_v18 = vld [vmem:[%s6177_s2 + $0xc8] ss:$16 sps:$4 sm:$0xff]   ;;  %v4826_v28 = vld [vmem:[%s6177_s2 + $0xe0] ss:$16 sps:$4 sm:$0xff]   ;;  %v4828_v29 = vld [vmem:[%s6177_s2 + $0xe4] ss:$16 sps:$4 sm:$0xff]  }
  0x6e   : > { %v4829_v31 = vld [vmem:[%s6177_s2 + $0xe8] ss:$16 sps:$4 sm:$0xff]   ;;  %v4831_v32 = vld [vmem:[%s6177_s2 + $0xec] ss:$16 sps:$4 sm:$0xff]   ;;  %v4834_v34 = vld [vmem:[%s6177_s2 + $0x104] ss:$16 sps:$4 sm:$0xff]  }
  0x6f   : > { %v4837_v35 = vld [vmem:[%s6177_s2 + $0x10c] ss:$16 sps:$4 sm:$0xff]   ;;  %v4832_v36 = vld [vmem:[%s6177_s2 + $0x100] ss:$16 sps:$4 sm:$0xff]   ;;  %v4835_v37 = vld [vmem:[%s6177_s2 + $0x108] ss:$16 sps:$4 sm:$0xff]  }
  0x70   : > { %4607 = vmatmul.mubr.bf16.vlgmr.msra.gmra.mrb[24].mxu0 %v4781_v49  ;;  %v4838_v38 = vld [vmem:[%s6177_s2 + $0x120] ss:$16 sps:$4 sm:$0xff]   ;;  %v4840_v39 = vld [vmem:[%s6177_s2 + $0x124] ss:$16 sps:$4 sm:$0xff]   ;;  %v4841_v40 = vld [vmem:[%s6177_s2 + $0x128] ss:$16 sps:$4 sm:$0xff]  }
  0x71   : > { %4610 = vmatprep.mubr.msk.bf16.mxu0 %vm5017_vm6, %v5016_v51  ;;  %3243 = vmatpush1.bf16.msra.mxu0 %v4787_v56  ;;  %v4843_v41 = vld [vmem:[%s6177_s2 + $0x12c] ss:$16 sps:$4 sm:$0xff]   ;;  %v4846_v42 = vld [vmem:[%s6177_s2 + $0x144] ss:$16 sps:$4 sm:$0xff]   ;;  %v4844_v44 = vld [vmem:[%s6177_s2 + $0x140] ss:$16 sps:$4 sm:$0xff]  }
  0x72   : > { %3244 = vmatprep.subr.bf16.mxu0 %v4795_v57  ;;  %v4849_v43 = vld [vmem:[%s6177_s2 + $0x14c] ss:$16 sps:$4 sm:$0xff]   ;;  %v4847_v45 = vld [vmem:[%s6177_s2 + $0x148] ss:$16 sps:$4 sm:$0xff]   ;;  %v4852_v46 = vld [vmem:[%s6177_s2 + $0x164] ss:$16 sps:$4 sm:$0xff]  }
  0x73   : > { %v4855_v47 = vld [vmem:[%s6177_s2 + $0x16c] ss:$16 sps:$4 sm:$0xff]   ;;  %v4850_v48 = vld [vmem:[%s6177_s2 + $0x160] ss:$16 sps:$4 sm:$0xff]   ;;  %v4853_v49 = vld [vmem:[%s6177_s2 + $0x168] ss:$16 sps:$4 sm:$0xff]  }
  0x74   : > { %v4861_v52 = vld [vmem:[%s6177_s2 + $0x18c] ss:$16 sps:$4 sm:$0xff]   ;;  %v4856_v57 = vld [vmem:[%s6177_s2 + $0x180] ss:$16 sps:$4 sm:$0xff]  }
  0x75   : > { %3245 = vmatpush1.bf16.msra.mxu0 %v4793_v59 }
  0x76   : > { %3246 = vmatprep.subr.bf16.mxu0 %v4801_v62  ;;  %v4864_v62 = vld [vmem:[%s6177_s2 + $0x1a4] ss:$16 sps:$4 sm:$0xff]  }
  0x78   : > { %4611 = vmatmul.mubr.bf16.gmra.mrb[28].mxu0 %v4782_v53  ;;  %v4858_v53 = vld [vmem:[%s6177_s2 + $0x184] ss:$16 sps:$4 sm:$0xff]  }
  0x79   : > { %4614 = vmatprep.mubr.msk.bf16.mxu0 %vm5017_vm6, %v5016_v51  ;;  %v4792_v51 = vld [vmem:[%s6177_s2 + $0x24] ss:$16 sps:$4 sm:$0xff]   ;;  %3247 = vmatpush1.bf16.msra.mxu0 %v4799_v0 }
  0x7a   : > { %3138 = vmatprep.subr.bf16.mxu1 %v4792_v51  ;;  %3248 = vmatprep.subr.bf16.mxu0 %v4807_v2  ;;  %v4867_v2 = vld [vmem:[%s6177_s2 + $0x1ac] ss:$16 sps:$4 sm:$0xff]  }
  0x7b   : > { %3139 = vmatpush1.bf16.msra.mxu1 %v4790_v58 }
  0x7c   : > { %3140 = vmatprep.subr.bf16.mxu1 %v4798_v61  ;;  %v4859_v61 = vld [vmem:[%s6177_s2 + $0x188] ss:$16 sps:$4 sm:$0xff]  }
  0x7d   : > { %3249 = vmatpush1.bf16.msra.mxu0 %v4805_v4 }
  0x7e   : > { %3250 = vmatprep.subr.bf16.mxu0 %v4813_v6  ;;  %v4862_v6 = vld [vmem:[%s6177_s2 + $0x1a0] ss:$16 sps:$4 sm:$0xff]  }
  0x7f   : > { %3141 = vmatpush1.bf16.msra.mxu1 %v4796_v63 }
  0x80   : > { %4615 = vmatmul.mubr.bf16.gmra.mrb[32].mxu0 %v4783_v50  ;;  %3142 = vmatprep.subr.bf16.mxu1 %v4804_v1 }
  0x81   : > { %3251 = vmatpush1.bf16.msra.mxu0 %v4811_v8  ;;  %v4870_v8 = vld [vmem:[%s6177_s2 + $0x1c4] ss:$16 sps:$4 sm:$0xff]  }
  0x82   : > { %3252 = vmatprep.subr.bf16.mxu0 %v4819_v10  ;;  %v4873_v10 = vld [vmem:[%s6177_s2 + $0x1cc] ss:$16 sps:$4 sm:$0xff]  }
  0x83   : > { %3143 = vmatpush1.bf16.msra.mxu1 %v4802_v3 }
  0x84   : > { %3144 = vmatprep.subr.bf16.mxu1 %v4810_v5 }
  0x85   : > { %3253 = vmatpush1.bf16.msra.mxu0 %v4817_v12  ;;  %v4871_v12 = vld [vmem:[%s6177_s2 + $0x1c8] ss:$16 sps:$4 sm:$0xff]  }
  0x86   : > { %3254 = vmatprep.subr.bf16.mxu0 %v4825_v15  ;;  %v4874_v15 = vld [vmem:[%s6177_s2 + $0x1e0] ss:$16 sps:$4 sm:$0xff]  }
  0x87   : > { %3145 = vmatpush1.bf16.msra.mxu1 %v4808_v7  ;;  %v4865_v7 = vld [vmem:[%s6177_s2 + $0x1a8] ss:$16 sps:$4 sm:$0xff]  }
  0x88   : > { %3146 = vmatprep.subr.bf16.mxu1 %v4816_v9 }
  0x89   : > { %3255 = vmatpush1.bf16.msra.mxu0 %v4823_v18 }
  0x8a   : > { %3256 = vmatprep.subr.bf16.mxu0 %v4831_v32 }
  0x8b   : > { %3147 = vmatpush1.bf16.msra.mxu1 %v4814_v11  ;;  %v4868_v11 = vld [vmem:[%s6177_s2 + $0x1c0] ss:$16 sps:$4 sm:$0xff]  }
  0x8c   : > { %3148 = vmatprep.subr.bf16.mxu1 %v4822_v14  ;;  %v4879_v14 = vld [vmem:[%s6177_s2 + $0x1ec] ss:$16 sps:$4 sm:$0xff]  }
  0x8d   : > { %3257 = vmatpush1.bf16.msra.mxu0 %v4829_v31 }
  0x8e   : > { %3258 = vmatprep.subr.bf16.mxu0 %v4837_v35 }
  0x8f   : > { %3149 = vmatpush1.bf16.msra.mxu1 %v4820_v17  ;;  %v4882_v17 = vld [vmem:[%s6177_s2 + $0x204] ss:$16 sps:$4 sm:$0xff]  }
  0x90   : > { %3150 = vmatprep.subr.bf16.mxu1 %v4828_v29 }
  0x91   : > { %3259 = vmatpush1.bf16.msra.mxu0 %v4835_v37 }
  0x92   : > { %3260 = vmatprep.subr.bf16.mxu0 %v4843_v41 }
  0x93   : > { %3151 = vmatpush1.bf16.msra.mxu1 %v4826_v28 }
  0x94   : > { %3152 = vmatprep.subr.bf16.mxu1 %v4834_v34 }
  0x95   : > { %3261 = vmatpush1.bf16.msra.mxu0 %v4841_v40 }
  0x96   : > { %3262 = vmatprep.subr.bf16.mxu0 %v4849_v43 }
  0x97   : > { %3153 = vmatpush1.bf16.msra.mxu1 %v4832_v36 }
  0x98   : > { %3154 = vmatprep.subr.bf16.mxu1 %v4840_v39 }
  0x99   : > { %3263 = vmatpush1.bf16.msra.mxu0 %v4847_v45 }
  0x9a   : > { %3264 = vmatprep.subr.bf16.mxu0 %v4855_v47 }
  0x9b   : > { %3155 = vmatpush1.bf16.msra.mxu1 %v4838_v38 }
  0x9c   : > { %3156 = vmatprep.subr.bf16.mxu1 %v4846_v42 }
  0x9d   : > { %3265 = vmatpush1.bf16.msra.mxu0 %v4853_v49 }
  0x9e   : > { %3266 = vmatprep.subr.bf16.mxu0 %v4861_v52 }
  0x9f   : > { %3157 = vmatpush1.bf16.msra.mxu1 %v4844_v44 }
  0xa0   : > { %3158 = vmatprep.subr.bf16.mxu1 %v4852_v46 }
  0xa1   : > { %3267 = vmatpush1.bf16.msra.mxu0 %v4859_v61 }
  0xa2   : > { %3268 = vmatprep.subr.bf16.mxu0 %v4867_v2 }
  0xa3   : > { %3159 = vmatpush1.bf16.msra.mxu1 %v4850_v48 }
  0xa4   : > { %3160 = vmatprep.subr.bf16.mxu1 %v4858_v53 }
  0xa5   : > { %3269 = vmatpush1.bf16.msra.mxu0 %v4865_v7 }
  0xa6   : > { %3270 = vmatprep.subr.bf16.mxu0 %v4873_v10  ;;  %v4275_v10 = vld [vmem:[%s6178_s3] ss:$0 sm:$0xff] }
  0xa7   : > { %3161 = vmatpush1.bf16.msra.mxu1 %v4856_v57 }
  0xa8   : > { %3162 = vmatprep.subr.bf16.mxu1 %v4864_v62 }
  0xa9   : > { %3271 = vmatpush1.bf16.msra.mxu0 %v4871_v12 }
  0xaa   : > { %3272 = vmatprep.subr.bf16.mxu0 %v4879_v14  ;;  %v4276_v14 = vld [vmem:[%s6179_s4] ss:$0 sm:$0xff] }
  0xab   : > { %3163 = vmatpush1.bf16.msra.mxu1 %v4862_v6 }
  0xac   : > { %3164 = vmatprep.subr.bf16.mxu1 %v4870_v8 }
  0xaf   : > { %3165 = vmatpush1.bf16.msra.mxu1 %v4868_v11 }
  0xfe   : > { %v4459_v19 = vpop.f32.mrb[0].mxu0 }
  0xff   : > { %v4493_v13 = vpop.f32.mrb[0].mxu1  ;;  %v4460_v22 = vpop.f32.mrb[1].mxu0 }
 0x100   : > { %v4494_v16 = vpop.f32.mrb[1].mxu1  ;;  %v4461_v24 = vadd.f32 %v4460_v22, %v4459_v19  ;;  %v4462_v25 = vpop.f32.mrb[2].mxu0 }
 0x101   : > { %v4495_v20 = vadd.f32 %v4494_v16, %v4493_v13  ;;  %v4496_v21 = vpop.f32.mrb[2].mxu1  ;;  %v4463_v27 = vpop.f32.mrb[3].mxu0  ;;  %v4876_v13 = vld [vmem:[%s6177_s2 + $0x1e4] ss:$16 sps:$4 sm:$0xff]   ;;  %v4877_v16 = vld [vmem:[%s6177_s2 + $0x1e8] ss:$16 sps:$4 sm:$0xff]  }
 0x102   : > { %v4497_v23 = vpop.f32.mrb[3].mxu1  ;;  %v4464_v30 = vadd.f32 %v4463_v27, %v4462_v25  ;;  %3166 = vmatprep.subr.bf16.mxu1 %v4876_v13  ;;  %3273 = vmatpush1.bf16.msra.mxu0 %v4877_v16 }
 0x103   : > { %v4498_v26 = vadd.f32 %v4497_v23, %v4496_v21  ;;  %v5578_v60 = vadd.f32 %v4495_v20, %v4461_v24  ;;  %v4885_v20 = vld [vmem:[%s6177_s2 + $0x20c] ss:$16 sps:$4 sm:$0xff]   ;;  %3167 = vmatpush1.bf16.msra.mxu1 %v4874_v15 }
 0x104   : > { %3189 = vmatprep.subr.bf16.mxu1 %v4882_v17  ;;  %3295 = vmatprep.subr.bf16.mxu0 %v4885_v20 }
 0x105   : > { %v5586_v33 = vadd.f32 %v4498_v26, %v4464_v30 }
 0x107   : > { %v4499_v50 = vpop.f32.mrb[4].mxu1 }
 0x108   : > { %v4500_v54 = vpop.f32.mrb[5].mxu1 }
 0x109   : > { %v4501_v56 = vadd.f32 %v4500_v54, %v4499_v50  ;;  %v4502_v51 = vpop.f32.mrb[6].mxu1 }
 0x10a   : > { %v4503_v59 = vpop.f32.mrb[7].mxu1 }
 0x10b   : > { %v4504_v1 = vadd.f32 %v4503_v59, %v4502_v51 }
 0x111   : > { %v4465_v55 = vpop.f32.mrb[4].mxu0 }
 0x112   : > { %v4466_v58 = vpop.f32.mrb[5].mxu0 }
 0x113   : > { %v4467_v63 = vadd.f32 %v4466_v58, %v4465_v55  ;;  %v4468_v0 = vpop.f32.mrb[6].mxu0  ;;  %v4505_v19 = vpop.f32.mrb[8].mxu1 }
 0x114   : > { %v4469_v3 = vpop.f32.mrb[7].mxu0  ;;  %v4506_v22 = vpop.f32.mrb[9].mxu1 }
 0x115   : > { %v5654_v4 = vadd.f32 %v4501_v56, %v4467_v63  ;;  %v4470_v5 = vadd.f32 %v4469_v3, %v4468_v0  ;;  %v4507_v25 = vadd.f32 %v4506_v22, %v4505_v19  ;;  %v4508_v26 = vpop.f32.mrb[10].mxu1 }
 0x116   : > { %v4509_v28 = vpop.f32.mrb[11].mxu1 }
 0x117   : > { %v1654_v9 = vadd.f32 %v4504_v1, %v4470_v5 }
 0x119   : > { %v4471_v18 = vpop.f32.mrb[8].mxu0 }
 0x11a   : > { %v4472_v21 = vpop.f32.mrb[9].mxu0 }
 0x11b   : > { %v4473_v23 = vadd.f32 %v4472_v21, %v4471_v18  ;;  %v4474_v24 = vpop.f32.mrb[10].mxu0  ;;  %v4277_v21 = vld [vmem:[%s6180_s5] ss:$0 sm:$0xff] }
 0x11c   : > { %v4475_v27 = vpop.f32.mrb[11].mxu0  ;;  %v4278_v24 = vld [vmem:[%s6181_s6] ss:$0 sm:$0xff] }
 0x11d   : > { %v1659_v29 = vadd.f32 %v4507_v25, %v4473_v23 }
 0x121   : > { %v4527_v30 = vpop.f32.mrb[12].mxu0 }
 0x122   : > { %v4528_v31 = vpop.f32.mrb[13].mxu0 }
 0x123   : > { %v4529_v32 = vadd.f32 %v4528_v31, %v4527_v30  ;;  %v4530_v34 = vpop.f32.mrb[14].mxu0 }
 0x124   : > { %v4531_v35 = vpop.f32.mrb[15].mxu0 }
 0x125   : > { %v1699_v36 = vadd.f32 %v4529_v32, %v5578_v60  ;;  %v4532_v37 = vadd.f32 %v4531_v35, %v4530_v34 }
 0x127   : > { %v1702_v38 = vadd.f32 %v4532_v37, %v5586_v33  ;;  %v4561_v39 = vpop.f32.mrb[12].mxu1 }
 0x128   : > { %v4562_v40 = vpop.f32.mrb[13].mxu1 }
 0x129   : > { %v4563_v41 = vadd.f32 %v4562_v40, %v4561_v39  ;;  %v4564_v42 = vpop.f32.mrb[14].mxu1 }
 0x12a   : > { %v4565_v43 = vpop.f32.mrb[15].mxu1 }
 0x12b   : > { %v4566_v44 = vadd.f32 %v4565_v43, %v4564_v42  ;;  %v1755_v45 = vadd.f32 %v4563_v41, %v1699_v36  ;;  %v4533_v46 = vpop.f32.mrb[16].mxu0 }
 0x12c   : > { %v4534_v47 = vpop.f32.mrb[17].mxu0 }
 0x12d   : > { %v1758_v48 = vadd.f32 %v4566_v44, %v1702_v38  ;;  %v4535_v49 = vadd.f32 %v4534_v47, %v4533_v46  ;;  %v4536_v53 = vpop.f32.mrb[18].mxu0 }
 0x12e   : > { %v4537_v50 = vpop.f32.mrb[19].mxu0 }
 0x12f   : > { %v1707_v52 = vadd.f32 %v4535_v49, %v5654_v4  ;;  %v4538_v54 = vadd.f32 %v4537_v50, %v4536_v53 }
 0x131   : > { %v1710_v60 = vadd.f32 %v4538_v54, %v1654_v9 }
 0x135   : > { %v4567_v55 = vpop.f32.mrb[16].mxu1 }
 0x136   : > { %v4568_v56 = vpop.f32.mrb[17].mxu1 }
 0x137   : > { %v4569_v33 = vadd.f32 %v4568_v56, %v4567_v55  ;;  %v4570_v51 = vpop.f32.mrb[18].mxu1 }
 0x138   : > { %v4571_v57 = vpop.f32.mrb[19].mxu1 }
 0x139   : > { %v4572_v58 = vadd.f32 %v4571_v57, %v4570_v51  ;;  %v1763_v59 = vadd.f32 %v4569_v33, %v1707_v52 }
 0x13b   : > { %v4539_v61 = vpop.f32.mrb[20].mxu0  ;;  %v1766_v62 = vadd.f32 %v4572_v58, %v1710_v60 }
 0x13c   : > { %v4540_v63 = vpop.f32.mrb[21].mxu0 }
 0x13d   : > { %v4541_v0 = vadd.f32 %v4540_v63, %v4539_v61  ;;  %v4542_v1 = vpop.f32.mrb[22].mxu0  ;;  %v1909_v61 = vld [vmem:[#allocation4 + $0x10] sm:$0xf] }
 0x13e   : > { %v4543_v2 = vpop.f32.mrb[23].mxu0 }
 0x13f   : > { %v1715_v3 = vadd.f32 %v4541_v0, %v1659_v29  ;;  %v4573_v5 = vpop.f32.mrb[20].mxu1 }
 0x140   : > { %v4574_v6 = vpop.f32.mrb[21].mxu1 }
 0x141   : > { %v4575_v7 = vadd.f32 %v4574_v6, %v4573_v5  ;;  %v4576_v4 = vpop.f32.mrb[22].mxu1 }
 0x142   : > { %v4577_v8 = vpop.f32.mrb[23].mxu1 }
 0x143   : > { %v1810_v9 = vpop.f32.mrb[24].mxu0  ;;  %v1771_v11 = vadd.f32 %v4575_v7, %v1715_v3 }
 0x144   : > { %v1811_v12 = vadd.f32 %v1810_v9, %v1755_v45  ;;  %v4608_v13 = vpop.f32.mrb[25].mxu0 }
 0x145   : > { %v1813_v15 = vpop.f32.mrb[26].mxu0 }
 0x146   : > { %v1839_v16 = vmul.f32 %v4275_v10, %v1811_v12  ;;  %v1814_v17 = vadd.f32 %v1813_v15, %v1758_v48  ;;  %v4609_v18 = vpop.f32.mrb[27].mxu0 }
 0x148   : > { %v1851_v19 = vadd.f32 %v4276_v14, %v1839_v16  ;;  %v1840_v20 = vmul.f32 %v4275_v10, %v1814_v17 }
 0x14a   : > { %v1856_v22 = vmax.f32 %v1851_v19, 0.0  ;;  %v1852_v23 = vadd.f32 %v4276_v14, %v1840_v20 }
 0x14b   : > { %v1818_v25 = vpop.f32.mrb[28].mxu0 }
 0x14c   : > { %v1868_v26 = vmul.f32 %v4277_v21, %v1856_v22  ;;  %v1857_v27 = vmax.f32 %v1852_v23, 0.0  ;;  %v1819_v28 = vadd.f32 %v1818_v25, %v1763_v59  ;;  %v4612_v29 = vpop.f32.mrb[29].mxu0  ;;  %v1906_v59 = vld [vmem:[#allocation4] sm:$0xf]  ;;  %v1965_v23 = vld [vmem:[#allocation4 + $0x14] sm:$0xf] }
 0x14d   : > { %v1821_v30 = vpop.f32.mrb[30].mxu0  ;;  %v1915_v29 = vld [vmem:[#allocation4 + $0x30] sm:$0xf] }
 0x14e   : > { %v1880_v31 = vadd.f32 %v4278_v24, %v1868_v26  ;;  %v1869_v32 = vmul.f32 %v4277_v21, %v1857_v27  ;;  %v1841_v34 = vmul.f32 %v4275_v10, %v1819_v28  ;;  %v1822_v35 = vadd.f32 %v1821_v30, %v1766_v62  ;;  %v4613_v36 = vpop.f32.mrb[31].mxu0  ;;  %v1979_v62 = vld [vmem:[#allocation4 + $0x8] sm:$0xf]  ;;  %v1912_v27 = vld [vmem:[#allocation4 + $0x20] sm:$0xf] }
 0x14f   : > { %v1982_v30 = vld [vmem:[#allocation4 + $0x18] sm:$0xf]  ;;  %v2035_v36 = vld [vmem:[#allocation4 + $0xc] sm:$0xf] }
 0x150   : > { %v1881_v37 = vadd.f32 %v4278_v24, %v1869_v32  ;;  %v1853_v38 = vadd.f32 %v4276_v14, %v1841_v34  ;;  %v1842_v39 = vmul.f32 %v4275_v10, %v1822_v35  ;;  %v1885_v40 = vmax.f32 %v1880_v31, 0.0  ;;  %v1962_v32 = vld [vmem:[#allocation4 + $0x4] sm:$0xf]  ;;  %v1985_v35 = vld [vmem:[#allocation4 + $0x28] sm:$0xf] }
 0x152   : > { %v1886_v41 = vmax.f32 %v1881_v37, 0.0  ;;  %v1858_v42 = vmax.f32 %v1853_v38, 0.0  ;;  %v1854_v43 = vadd.f32 %v4276_v14, %v1842_v39 }
 0x153   : > { %v1826_v44 = vpop.f32.mrb[32].mxu0 }
 0x154   : > { %v4435_v45 = vpack.c.bf16 %v1886_v41, %v1885_v40  ;;  %v1870_v46 = vmul.f32 %v4277_v21, %v1858_v42  ;;  %v1859_v47 = vmax.f32 %v1854_v43, 0.0  ;;  %v1827_v48 = vadd.f32 %v1826_v44, %v1771_v11  ;;  %v4616_v49 = vpop.f32.mrb[33].mxu0 }
 0x155   : > { %v1829_v53 = vpop.f32.mrb[34].mxu0 }
 0x156   : > { %4436 = vst [vmem:[#allocation3] sm:$0xff] %v4435_v45   ;;  %v1882_v50 = vadd.f32 %v4278_v24, %v1870_v46  ;;  %v1871_v52 = vmul.f32 %v4277_v21, %v1859_v47  ;;  %v1843_v54 = vmul.f32 %v4275_v10, %v1827_v48  ;;  %v4617_v60 = vpop.f32.mrb[35].mxu0 }
 0x158   : > { %v1883_v55 = vadd.f32 %v4278_v24, %v1871_v52  ;;  %v1855_v56 = vadd.f32 %v4276_v14, %v1843_v54  ;;  %v1887_v33 = vmax.f32 %v1882_v50, 0.0 }
 0x15a   : > { %v1888_v51 = vmax.f32 %v1883_v55, 0.0  ;;  %v1860_v57 = vmax.f32 %v1855_v56, 0.0 }
 0x15c   : > { %v4440_v63 = vpack.c.bf16 %v1888_v51, %v1887_v33  ;;  %v1872_v0 = vmul.f32 %v4277_v21, %v1860_v57 }
 0x15d   : > { %v1900_v1 = vld [vmem:[#allocation3] sm:$0xf]  ;;  %v1901_v2 = vld [vmem:[#allocation3 + $0x4] sm:$0xf] }
 0x15e   : > { %v1918_v3 = vld [vmem:[#allocation3] sm:$0xf]  ;;  %v1907_v5 = vsel %vm5708_vm8, %v1900_v1, %v1906_v59  ;;  %v1910_v6 = vsel %vm5708_vm8, %v1901_v2, %v1909_v61  ;;  %v1919_v7 = vld [vmem:[#allocation3 + $0x4] sm:$0xf]  ;;  %4442 = vst [vmem:[#allocation3 + $0x8] sm:$0xff] %v4440_v63   ;;  %v1884_v14 = vadd.f32 %v4278_v24, %v1872_v0 }
 0x15f   : > { %v1923_v4 = vshrl.u32 %v1918_v3, 16  ;;  %v1926_v8 = vshll.u32 %v1918_v3, 16  ;;  %v1975_v9 = vld [vmem:[#allocation3 + $0x4] sm:$0xf]  ;;  %1908 = vst [vmem:[#allocation4] sm:$0xf] %v1907_v5 }
 0x160   : > { %1911 = vst [vmem:[#allocation4 + $0x10] sm:$0xf] %v1910_v6  ;;  %v1932_v10 = vshrl.u32 %v1919_v7, 16  ;;  %v1935_v11 = vshll.u32 %v1919_v7, 16  ;;  %v1980_v12 = vsel %vm5708_vm8, %v1975_v9, %v1979_v62  ;;  %v1991_v13 = vld [vmem:[#allocation3 + $0x4] sm:$0xf]  ;;  %v2082_v6 = vlaneseq }
 0x161   : > { %v1925_v15 = vrot.slane %v1923_v4, 4  ;;  %v1928_v16 = vrot.slane %v1926_v8, 5  ;;  %1981 = vst [vmem:[#allocation4 + $0x8] sm:$0xf] %v1980_v12  ;;  %v1996_v17 = vshrl.u32 %v1991_v13, 16  ;;  %v1999_v18 = vshll.u32 %v1991_v13, 16 }
 0x162   : > { %v1934_v19 = vrot.slane %v1932_v10, 4  ;;  %v1937_v20 = vrot.slane %v1935_v11, 5  ;;  %v1889_v21 = vmax.f32 %v1884_v14, 0.0  ;;  %v1988_v1 = vld [vmem:[#allocation4 + $0x38] sm:$0xf] }
 0x163   : > { %v1929_v22 = vor.u32 %v1928_v16, %v1925_v15  ;;  %v1998_v25 = vrot.slane %v1996_v17, 4  ;;  %v2001_v26 = vrot.slane %v1999_v18, 5  ;;  %v1968_v5 = vld [vmem:[#allocation4 + $0x24] sm:$0xf]  ;;  %v1971_v12 = vld [vmem:[#allocation4 + $0x34] sm:$0xf] }
 0x164   : > { %v1938_v28 = vor.u32 %v1937_v20, %v1934_v19  ;;  %v1894_v31 = vpack.c.bf16 %v1889_v21, %v1889_v21  ;;  %v5018_v16 = vmov 1966171168  }
 0x165   : > { %v1930_v34 = vrot.slane %v1929_v22, 4  ;;  %v2002_v24 = vor.u32 %v2001_v26, %v1998_v25  ;;  %v1902_v38 = vld [vmem:[#allocation3 + $0x8] sm:$0xf]  ;;  %v1903_v39 = vld [vmem:[#allocation3 + $0xc] sm:$0xf]  ;;  %v2080_v17 = vunpack.c.l.s4 %v5018_v16 }
 0x166   : > { %v1939_v37 = vrot.slane %v1938_v28, 4  ;;  %1899 = vst [vmem:[#allocation3 + $0x10] sm:$0xf] %v1894_v31  ;;  %v1913_v41 = vsel %vm5708_vm8, %v1902_v38, %v1912_v27  ;;  %v1916_v42 = vsel %vm5708_vm8, %v1903_v39, %v1915_v29  ;;  %v1920_v43 = vld [vmem:[#allocation3 + $0x8] sm:$0xf] }
 0x167   : > { %v2003_v40 = vrot.slane %v2002_v24, 4  ;;  %v1921_v44 = vld [vmem:[#allocation3 + $0xc] sm:$0xf]  ;;  %v1963_v45 = vsel %vm5708_vm8, %v1930_v34, %v1962_v32  ;;  %1914 = vst [vmem:[#allocation4 + $0x20] sm:$0xf] %v1913_v41  ;;  %v1941_v47 = vshrl.u32 %v1920_v43, 16 }
 0x168   : > { %v1966_v46 = vsel %vm5708_vm8, %v1939_v37, %v1965_v23  ;;  %1917 = vst [vmem:[#allocation4 + $0x30] sm:$0xf] %v1916_v42  ;;  %v1944_v48 = vshll.u32 %v1920_v43, 16  ;;  %v1950_v49 = vshrl.u32 %v1921_v44, 16  ;;  %v1976_v53 = vld [vmem:[#allocation3 + $0x8] sm:$0xf] }
 0x169   : > { %1964 = vst [vmem:[#allocation4 + $0x4] sm:$0xf] %v1963_v45  ;;  %1967 = vst [vmem:[#allocation4 + $0x14] sm:$0xf] %v1966_v46  ;;  %v1953_v50 = vshll.u32 %v1921_v44, 16  ;;  %v1983_v54 = vsel %vm5708_vm8, %v1976_v53, %v1982_v30  ;;  %v2036_v55 = vsel %vm5708_vm8, %v2003_v40, %v2035_v36  ;;  %v1943_v56 = vrot.slane %v1941_v47, 4 }
 0x16a   : > { %v1977_v52 = vld [vmem:[#allocation3 + $0xc] sm:$0xf]  ;;  %v1992_v60 = vld [vmem:[#allocation3 + $0x8] sm:$0xf]  ;;  %v1946_v33 = vrot.slane %v1944_v48, 5  ;;  %v1952_v51 = vrot.slane %v1950_v49, 4 }
 0x16b   : > { %1984 = vst [vmem:[#allocation4 + $0x18] sm:$0xf] %v1983_v54  ;;  %v1986_v57 = vsel %vm5708_vm8, %v1977_v52, %v1985_v35  ;;  %v1993_v59 = vld [vmem:[#allocation3 + $0xc] sm:$0xf]  ;;  %2037 = vst [vmem:[#allocation4 + $0xc] sm:$0xf] %v2036_v55  ;;  %v2081_v35 = vunpack.c.0.s8 %v2080_v17 }
 0x16c   : > { %v1955_v61 = vrot.slane %v1953_v50, 5  ;;  %1987 = vst [vmem:[#allocation4 + $0x28] sm:$0xf] %v1986_v57  ;;  %v2005_v62 = vshrl.u32 %v1992_v60, 16  ;;  %v2008_v63 = vshll.u32 %v1992_v60, 16  ;;  %v2014_v0 = vshrl.u32 %v1993_v59, 16 }
 0x16d   : > { %v1947_v2 = vor.u32 %v1946_v33, %v1943_v56  ;;  %v2017_v3 = vshll.u32 %v1993_v59, 16  ;;  %v1978_v10 = vld [vmem:[#allocation3 + $0x10] sm:$0xf]  ;;  %v2041_v30 = vld [vmem:[#allocation4 + $0x2c] sm:$0xf]  ;;  %v5740_v36 = vshrl.u32 %v2082_v6, 7 }
 0x16e   : > { %v1956_v7 = vor.u32 %v1955_v61, %v1952_v51  ;;  %v2007_v4 = vrot.slane %v2005_v62, 4  ;;  %v2010_v8 = vrot.slane %v2008_v63, 5  ;;  %v2016_v9 = vrot.slane %v2014_v0, 4  ;;  %v1994_v15 = vld [vmem:[#allocation3 + $0x10] sm:$0xf] }
 0x16f   : > { %v1948_v11 = vrot.slane %v1947_v2, 4  ;;  %v2019_v13 = vrot.slane %v2017_v3, 5  ;;  %v1989_v14 = vsel %vm5708_vm8, %v1978_v10, %v1988_v1  ;;  %v2023_v20 = vshrl.u32 %v1994_v15, 16  ;;  %v2038_v23 = vld [vmem:[#allocation4 + $0x1c] sm:$0xf] }
 0x170   : > { %v1957_v18 = vrot.slane %v1956_v7, 4  ;;  %v2011_v19 = vor.u32 %v2010_v8, %v2007_v4  ;;  %1990 = vst [vmem:[#allocation4 + $0x38] sm:$0xf] %v1989_v14  ;;  %v2026_v21 = vshll.u32 %v1994_v15, 16  ;;  %v2044_v24 = vld [vmem:[#allocation4 + $0x3c] sm:$0xf]  ;;  %v5747_v44 = vsub.s32 %v2081_v35, %v5740_v36 }
 0x171   : > { %v2020_v22 = vor.u32 %v2019_v13, %v2016_v9  ;;  %v1969_v25 = vsel %vm5708_vm8, %v1948_v11, %v1968_v5  ;;  %v2025_v28 = vrot.slane %v2023_v20, 4  ;;  %v4279_v38 = vld.sshfl [vmem:[#allocation4] sm:$0xff pattern:$0x75316420] }
 0x172   : > { %v1972_v26 = vsel %vm5708_vm8, %v1957_v18, %v1971_v12  ;;  %v2012_v27 = vrot.slane %v2011_v19, 4  ;;  %v2028_v29 = vrot.slane %v2026_v21, 5  ;;  %1970 = vst [vmem:[#allocation4 + $0x24] sm:$0xf] %v1969_v25 }
 0x173   : > { %v2021_v31 = vrot.slane %v2020_v22, 4  ;;  %1973 = vst [vmem:[#allocation4 + $0x34] sm:$0xf] %v1972_v26  ;;  %v4280_v39 = vld.sshfl [vmem:[#allocation4 + $0x8] sm:$0xff pattern:$0x75316420] }
 0x174   : > { %v2039_v32 = vsel %vm5708_vm8, %v2012_v27, %v2038_v23  ;;  %v2029_v34 = vor.u32 %v2028_v29, %v2025_v28  ;;  %v2077_v42 = vcombine.low %v4279_v38, %v4280_v39  ;;  %v2078_v43 = vcombine.high %v4279_v38, %v4280_v39  ;;  %v4281_v46 = vld.sshfl [vmem:[#allocation4 + $0x10] sm:$0xff pattern:$0x75316420] }
 0x175   : > { %2040 = vst [vmem:[#allocation4 + $0x1c] sm:$0xf] %v2039_v32  ;;  %v2042_v37 = vsel %vm5708_vm8, %v2021_v31, %v2041_v30 }
 0x176   : > { %v2030_v40 = vrot.slane %v2029_v34, 4  ;;  %2043 = vst [vmem:[#allocation4 + $0x2c] sm:$0xf] %v2042_v37  ;;  %v2085_v48 = vrot.slane %v2077_v42, %v5747_v44  ;;  %v2092_v49 = vrot.slane %v2078_v43, %v5747_v44 }
 0x178   : > { %v2045_v41 = vsel %vm5708_vm8, %v2030_v40, %v2044_v24  ;;  %v2093_v56 = vcombine.high %v2085_v48, %v2085_v48  ;;  %v2094_v33 = vcombine.high %v2092_v49, %v2092_v49  ;;  %v2361_v57 = vcombine.low %v2085_v48, %v2092_v49 }
 0x179   : > { %2046 = vst [vmem:[#allocation4 + $0x3c] sm:$0xf] %v2045_v41  ;;  %v4283_v45 = vld.sshfl [vmem:[#allocation4 + $0x20] sm:$0xff pattern:$0x75316420] }
 0x17a   : > { %v4285_v0 = vld.sshfl [vmem:[#allocation4 + $0x30] sm:$0xff pattern:$0x75316420]  ;;  %v2371_v20 = vrot.slane %v2361_v57, %v5747_v44 }
 0x17c   : > { %v4282_v47 = vld.sshfl [vmem:[#allocation4 + $0x18] sm:$0xff pattern:$0x75316420] }
 0x17d   : > { %v4284_v53 = vld.sshfl [vmem:[#allocation4 + $0x28] sm:$0xff pattern:$0x75316420]  ;;  %v2109_v50 = vcombine.low %v4281_v46, %v4282_v47  ;;  %v2110_v52 = vcombine.high %v4281_v46, %v4282_v47 }
 0x17e   : > { %v2141_v54 = vcombine.low %v4283_v45, %v4284_v53  ;;  %v2142_v60 = vcombine.high %v4283_v45, %v4284_v53  ;;  %v4880_v53 = vld [vmem:[%s6177_s2 + $0x200] ss:$16 sps:$4 sm:$0xff]  }
 0x17f   : > { %v2117_v58 = vrot.slane %v2109_v50, %v5747_v44  ;;  %v2124_v55 = vrot.slane %v2110_v52, %v5747_v44  ;;  %v4883_v50 = vld [vmem:[%s6177_s2 + $0x208] ss:$16 sps:$4 sm:$0xff]  }
 0x180   : > { %v2149_v51 = vrot.slane %v2141_v54, %v5747_v44  ;;  %v4286_v59 = vld.sshfl [vmem:[#allocation4 + $0x38] sm:$0xff pattern:$0x75316420]  ;;  %v2156_v1 = vrot.slane %v2142_v60, %v5747_v44 }
 0x181   : > { %v2125_v61 = vcombine.high %v2117_v58, %v2117_v58  ;;  %v2199_v62 = vunpack.i.h.s16 %v2117_v58  ;;  %v2201_v63 = vunpack.i.h.s16 %v2124_v55  ;;  %v2126_v2 = vcombine.high %v2124_v55, %v2124_v55  ;;  %v4888_v60 = vld [vmem:[%s6177_s2 + $0x224] ss:$16 sps:$4 sm:$0xff]  }
 0x182   : > { %v4287_v3 = vpack.i.b16 %v2117_v58, %v2094_v33  ;;  %v2157_v5 = vcombine.high %v2149_v51, %v2149_v51  ;;  %v2173_v6 = vcombine.low %v4285_v0, %v4286_v59  ;;  %v2174_v9 = vcombine.high %v4285_v0, %v4286_v59  ;;  %v4891_v58 = vld [vmem:[%s6177_s2 + $0x22c] ss:$16 sps:$4 sm:$0xff]   ;;  %v4894_v0 = vld [vmem:[%s6177_s2 + $0x244] ss:$16 sps:$4 sm:$0xff]  }
 0x183   : > { %v2203_v7 = vunpack.i.h.s16 %v2125_v61  ;;  %v4288_v4 = vpack.i.b16 %v2124_v55, %v2199_v62  ;;  %v4289_v8 = vpack.i.b16 %v2125_v61, %v2201_v63  ;;  %v2158_v16 = vcombine.high %v2156_v1, %v2156_v1  ;;  %v4886_v61 = vld [vmem:[%s6177_s2 + $0x220] ss:$16 sps:$4 sm:$0xff]   ;;  %v4889_v62 = vld [vmem:[%s6177_s2 + $0x228] ss:$16 sps:$4 sm:$0xff]  }
 0x184   : > { %v2362_v10 = vcombine.low %v2093_v56, %v4287_v3  ;;  %v2181_v11 = vrot.slane %v2173_v6, %v5747_v44  ;;  %v2188_v14 = vrot.slane %v2174_v9, %v5747_v44  ;;  %v2429_v22 = vcombine.low %v2156_v1, %v2157_v5  ;;  %v4897_v1 = vld [vmem:[%s6177_s2 + $0x24c] ss:$16 sps:$4 sm:$0xff]   ;;  %v4895_v3 = vld [vmem:[%s6177_s2 + $0x248] ss:$16 sps:$4 sm:$0xff]   ;;  %v4900_v6 = vld [vmem:[%s6177_s2 + $0x264] ss:$16 sps:$4 sm:$0xff]  }
 0x185   : > { %v4290_v12 = vpack.i.b16 %v2126_v2, %v2203_v7  ;;  %v2363_v13 = vcombine.low %v4288_v4, %v4289_v8  ;;  %v4892_v2 = vld [vmem:[%s6177_s2 + $0x240] ss:$16 sps:$4 sm:$0xff]   ;;  %v4903_v7 = vld [vmem:[%s6177_s2 + $0x26c] ss:$16 sps:$4 sm:$0xff]   ;;  %v4901_v9 = vld [vmem:[%s6177_s2 + $0x268] ss:$16 sps:$4 sm:$0xff]  }
 0x186   : > { %v2378_v15 = vrot.slane %v2362_v10, %v5747_v44  ;;  %v2189_v17 = vcombine.high %v2181_v11, %v2181_v11  ;;  %v2213_v18 = vunpack.i.h.s16 %v2181_v11  ;;  %v2215_v21 = vunpack.i.h.s16 %v2188_v14  ;;  %v4898_v8 = vld [vmem:[%s6177_s2 + $0x260] ss:$16 sps:$4 sm:$0xff]   ;;  %v4906_v10 = vld [vmem:[%s6177_s2 + $0x284] ss:$16 sps:$4 sm:$0xff]  }
 0x187   : > { %v2364_v19 = vcombine.low %v4290_v12, %v2149_v51  ;;  %v2190_v23 = vcombine.high %v2188_v14, %v2188_v14  ;;  %v4291_v26 = vpack.i.b16 %v2181_v11, %v2158_v16  ;;  %v2385_v28 = vrot.slane %v2363_v13, %v5747_v44  ;;  %v4909_v11 = vld [vmem:[%s6177_s2 + $0x28c] ss:$16 sps:$4 sm:$0xff]   ;;  %v4904_v12 = vld [vmem:[%s6177_s2 + $0x280] ss:$16 sps:$4 sm:$0xff]   ;;  %v4907_v13 = vld [vmem:[%s6177_s2 + $0x288] ss:$16 sps:$4 sm:$0xff]  }
 0x188   : > { %v2217_v25 = vunpack.i.h.s16 %v2189_v17  ;;  %v4292_v27 = vpack.i.b16 %v2188_v14, %v2213_v18  ;;  %v2393_v30 = vcombine.low %v2371_v20, %v2378_v15  ;;  %v2394_v31 = vcombine.high %v2371_v20, %v2378_v15  ;;  %v4912_v14 = vld [vmem:[%s6177_s2 + $0x2a4] ss:$16 sps:$4 sm:$0xff]   ;;  %v4915_v15 = vld [vmem:[%s6177_s2 + $0x2ac] ss:$16 sps:$4 sm:$0xff]   ;;  %v4910_v16 = vld [vmem:[%s6177_s2 + $0x2a0] ss:$16 sps:$4 sm:$0xff]  }
 0x189   : > { %v2392_v29 = vrot.slane %v2364_v19, %v5747_v44  ;;  %v4293_v32 = vpack.i.b16 %v2189_v17, %v2215_v21  ;;  %v2438_v39 = vrot.slane %v2429_v22, %v5747_v44  ;;  %v4913_v17 = vld [vmem:[%s6177_s2 + $0x2a8] ss:$16 sps:$4 sm:$0xff]   ;;  %v4918_v18 = vld [vmem:[%s6177_s2 + $0x2c4] ss:$16 sps:$4 sm:$0xff]   ;;  %v4921_v19 = vld [vmem:[%s6177_s2 + $0x2cc] ss:$16 sps:$4 sm:$0xff]  }
 0x18a   : > { %v4294_v34 = vpack.i.b16 %v2190_v23, %v2217_v25  ;;  %v2430_v24 = vcombine.low %v4291_v26, %v4292_v27  ;;  %v2410_v41 = vrot.slane %v2394_v31, %v5747_v44  ;;  %v2403_v43 = vrot.slane %v2393_v30, %v5747_v44  ;;  %v4916_v20 = vld [vmem:[%s6177_s2 + $0x2c0] ss:$16 sps:$4 sm:$0xff]   ;;  %v4919_v21 = vld [vmem:[%s6177_s2 + $0x2c8] ss:$16 sps:$4 sm:$0xff]   ;;  %v4924_v22 = vld [vmem:[%s6177_s2 + $0x2e4] ss:$16 sps:$4 sm:$0xff]  }
 0x18b   : > { %v2395_v35 = vcombine.low %v2385_v28, %v2392_v29  ;;  %v2396_v37 = vcombine.high %v2385_v28, %v2392_v29  ;;  %v4927_v23 = vld [vmem:[%s6177_s2 + $0x2ec] ss:$16 sps:$4 sm:$0xff]   ;;  %v4922_v25 = vld [vmem:[%s6177_s2 + $0x2e0] ss:$16 sps:$4 sm:$0xff]   ;;  %v4925_v26 = vld [vmem:[%s6177_s2 + $0x2e8] ss:$16 sps:$4 sm:$0xff]  }
 0x18c   : > { %v2431_v38 = vcombine.low %v4293_v32, %v4294_v34  ;;  %v2445_v40 = vrot.slane %v2430_v24, %v5747_v44  ;;  %v4930_v27 = vld [vmem:[%s6177_s2 + $0x304] ss:$16 sps:$4 sm:$0xff]   ;;  %v4933_v28 = vld [vmem:[%s6177_s2 + $0x30c] ss:$16 sps:$4 sm:$0xff]   ;;  %v4928_v29 = vld [vmem:[%s6177_s2 + $0x300] ss:$16 sps:$4 sm:$0xff]  }
 0x18d   : > { %v2424_v42 = vrot.slane %v2396_v37, %v5747_v44  ;;  %v2417_v45 = vrot.slane %v2395_v35, %v5747_v44  ;;  %v4931_v30 = vld [vmem:[%s6177_s2 + $0x308] ss:$16 sps:$4 sm:$0xff]   ;;  %v4936_v31 = vld [vmem:[%s6177_s2 + $0x324] ss:$16 sps:$4 sm:$0xff]   ;;  %v4939_v32 = vld [vmem:[%s6177_s2 + $0x32c] ss:$16 sps:$4 sm:$0xff]  }
 0x18e   : > { %v2452_v46 = vrot.slane %v2431_v38, %v5747_v44  ;;  %v2454_v47 = vcombine.high %v2438_v39, %v2445_v40  ;;  %v2453_v48 = vcombine.low %v2438_v39, %v2445_v40  ;;  %v4934_v34 = vld [vmem:[%s6177_s2 + $0x320] ss:$16 sps:$4 sm:$0xff]   ;;  %v4937_v24 = vld [vmem:[%s6177_s2 + $0x328] ss:$16 sps:$4 sm:$0xff]   ;;  %v4942_v35 = vld [vmem:[%s6177_s2 + $0x344] ss:$16 sps:$4 sm:$0xff]  }
 0x18f   : > { %v2427_v49 = vcombine.low %v2410_v41, %v2424_v42  ;;  %v2425_v52 = vcombine.low %v2403_v43, %v2417_v45  ;;  %v5774_v54 = vcombine.high %v2403_v43, %v2417_v45  ;;  %v2428_v4 = vcombine.high %v2410_v41, %v2424_v42  ;;  %v4945_v37 = vld [vmem:[%s6177_s2 + $0x34c] ss:$16 sps:$4 sm:$0xff]   ;;  %v4940_v38 = vld [vmem:[%s6177_s2 + $0x340] ss:$16 sps:$4 sm:$0xff]   ;;  %v4943_v39 = vld [vmem:[%s6177_s2 + $0x348] ss:$16 sps:$4 sm:$0xff]  }
 0x190   : > { %v2455_v55 = vcombine.high %v2452_v46, %v2452_v46  ;;  %v2462_v56 = vrot.slane %v2453_v48, %v5747_v44  ;;  %v2476_v33 = vrot.slane %v2452_v46, %v5747_v44  ;;  %v5785_v51 = vrot.slane %v2454_v47, %v5747_v44  ;;  %v4948_v40 = vld [vmem:[%s6177_s2 + $0x364] ss:$16 sps:$4 sm:$0xff]   ;;  %v4951_v41 = vld [vmem:[%s6177_s2 + $0x36c] ss:$16 sps:$4 sm:$0xff]   ;;  %v4946_v42 = vld [vmem:[%s6177_s2 + $0x360] ss:$16 sps:$4 sm:$0xff]  }
 0x191   : > { %3168 = vmatprep.mubr.bf16.mxu1 %v2427_v49  ;;  %3274 = vmatprep.mubr.bf16.mxu0 %v2427_v49  ;;  %v4949_v43 = vld [vmem:[%s6177_s2 + $0x368] ss:$16 sps:$4 sm:$0xff]   ;;  %v4954_v45 = vld [vmem:[%s6177_s2 + $0x384] ss:$16 sps:$4 sm:$0xff]   ;;  %v4957_v46 = vld [vmem:[%s6177_s2 + $0x38c] ss:$16 sps:$4 sm:$0xff]  }
 0x192   : > { %3169 = vmatmul.mubr.bf16.vlgmr.msra.gmra.mrb[24].mxu1 %v2425_v52  ;;  %3275 = vmatmul.mubr.bf16.vlgmr.msra.gmra.mrb[36].mxu0 %v2425_v52  ;;  %v5788_v57 = vrot.slane %v2455_v55, %v5747_v44  ;;  %v5790_v59 = vcombine.high %v2462_v56, %v2476_v33  ;;  %v2484_v5 = vcombine.low %v2462_v56, %v2476_v33  ;;  %v4952_v47 = vld [vmem:[%s6177_s2 + $0x380] ss:$16 sps:$4 sm:$0xff]   ;;  %v4955_v48 = vld [vmem:[%s6177_s2 + $0x388] ss:$16 sps:$4 sm:$0xff]   ;;  %v4960_v49 = vld [vmem:[%s6177_s2 + $0x3a4] ss:$16 sps:$4 sm:$0xff]  }
 0x193   : > { %3190 = vmatpush1.bf16.msra.mxu1 %v4880_v53  ;;  %3296 = vmatpush1.bf16.msra.mxu0 %v4883_v50  ;;  %v4963_v53 = vld [vmem:[%s6177_s2 + $0x3ac] ss:$16 sps:$4 sm:$0xff]   ;;  %v4958_v50 = vld [vmem:[%s6177_s2 + $0x3a0] ss:$16 sps:$4 sm:$0xff]   ;;  %v4961_v52 = vld [vmem:[%s6177_s2 + $0x3a8] ss:$16 sps:$4 sm:$0xff]  }
 0x194   : > { %3191 = vmatprep.subr.bf16.mxu1 %v4888_v60  ;;  %3297 = vmatprep.subr.bf16.mxu0 %v4891_v58  ;;  %v2486_v63 = vcombine.low %v5785_v51, %v5788_v57  ;;  %v4966_v60 = vld [vmem:[%s6177_s2 + $0x3c4] ss:$16 sps:$4 sm:$0xff]   ;;  %v4969_v58 = vld [vmem:[%s6177_s2 + $0x3cc] ss:$16 sps:$4 sm:$0xff]   ;;  %v4964_v55 = vld [vmem:[%s6177_s2 + $0x3c0] ss:$16 sps:$4 sm:$0xff]  }
 0x195   : > { %v4967_v56 = vld [vmem:[%s6177_s2 + $0x3c8] ss:$16 sps:$4 sm:$0xff]   ;;  %v4972_v33 = vld [vmem:[%s6177_s2 + $0x3e4] ss:$16 sps:$4 sm:$0xff]  }
 0x196   : > { %3178 = vmatprep.mubr.bf16.mxu1 %v2486_v63  ;;  %3284 = vmatprep.mubr.bf16.mxu0 %v2486_v63  ;;  %v4973_v63 = vld [vmem:[%s6177_s2 + $0x3e8] ss:$16 sps:$4 sm:$0xff]  }
 0x197   : > { %3192 = vmatpush1.bf16.msra.mxu1 %v4886_v61  ;;  %3298 = vmatpush1.bf16.msra.mxu0 %v4889_v62  ;;  %v4975_v61 = vld [vmem:[%s6177_s2 + $0x3ec] ss:$16 sps:$4 sm:$0xff]   ;;  %v4970_v62 = vld [vmem:[%s6177_s2 + $0x3e0] ss:$16 sps:$4 sm:$0xff]  }
 0x198   : > { %3193 = vmatprep.subr.bf16.mxu1 %v4894_v0  ;;  %3299 = vmatprep.subr.bf16.mxu0 %v4897_v1  ;;  %v2487_v0 = vcombine.high %v5785_v51, %v5788_v57  ;;  %v3352_v1 = vsub.s32 0, %v5740_v36  ;;  %v3356_v51 = vsub.s32 1, %v5740_v36  ;;  %v3364_v57 = vsub.s32 3, %v5740_v36 }
 0x19a   : > { %3179 = vmatmul.mubr.bf16.gmra.mrb[28].mxu1 %v2484_v5  ;;  %3285 = vmatmul.mubr.bf16.gmra.mrb[40].mxu0 %v2484_v5 }
 0x19b   : > { %3194 = vmatpush1.bf16.msra.mxu1 %v4892_v2  ;;  %3300 = vmatpush1.bf16.msra.mxu0 %v4895_v3  ;;  %v3360_v2 = vsub.s32 2, %v5740_v36  ;;  %v3348_v3 = vld [vmem:[%s6182_s7] sm:$0xf] }
 0x19c   : > { %3221 = vmatprep.mubr.bf16.mxu1 %v2428_v4  ;;  %3327 = vmatprep.mubr.bf16.mxu0 %v2428_v4  ;;  %v5984_v5 = vrot.slane %v3348_v3, %v3352_v1 }
 0x19d   : > { %3195 = vmatprep.subr.bf16.mxu1 %v4900_v6  ;;  %3301 = vmatprep.subr.bf16.mxu0 %v4903_v7  ;;  %v5986_v6 = vrot.slane %v3348_v3, %v3360_v2  ;;  %v5990_v7 = vrot.slane %v3348_v3, %v3364_v57 }
 0x19f   : > { %3196 = vmatpush1.bf16.msra.mxu1 %v4898_v8  ;;  %3302 = vmatpush1.bf16.msra.mxu0 %v4901_v9 }
 0x1a0   : > { %3197 = vmatprep.subr.bf16.mxu1 %v4906_v10  ;;  %3303 = vmatprep.subr.bf16.mxu0 %v4909_v11 }
 0x1a3   : > { %3198 = vmatpush1.bf16.msra.mxu1 %v4904_v12  ;;  %3304 = vmatpush1.bf16.msra.mxu0 %v4907_v13 }
 0x1a4   : > { %3199 = vmatprep.subr.bf16.mxu1 %v4912_v14  ;;  %3305 = vmatprep.subr.bf16.mxu0 %v4915_v15 }
 0x1a7   : > { %3200 = vmatpush1.bf16.msra.mxu1 %v4910_v16  ;;  %3306 = vmatpush1.bf16.msra.mxu0 %v4913_v17 }
 0x1a8   : > { %3201 = vmatprep.subr.bf16.mxu1 %v4918_v18  ;;  %3307 = vmatprep.subr.bf16.mxu0 %v4921_v19 }
 0x1ab   : > { %3202 = vmatpush1.bf16.msra.mxu1 %v4916_v20  ;;  %3308 = vmatpush1.bf16.msra.mxu0 %v4919_v21 }
 0x1ac   : > { %3203 = vmatprep.subr.bf16.mxu1 %v4924_v22  ;;  %3309 = vmatprep.subr.bf16.mxu0 %v4927_v23 }
 0x1af   : > { %3204 = vmatpush1.bf16.msra.mxu1 %v4922_v25  ;;  %3310 = vmatpush1.bf16.msra.mxu0 %v4925_v26 }
 0x1b0   : > { %3205 = vmatprep.subr.bf16.mxu1 %v4930_v27  ;;  %3311 = vmatprep.subr.bf16.mxu0 %v4933_v28 }
 0x1b3   : > { %3206 = vmatpush1.bf16.msra.mxu1 %v4928_v29  ;;  %3312 = vmatpush1.bf16.msra.mxu0 %v4931_v30 }
 0x1b4   : > { %3207 = vmatprep.subr.bf16.mxu1 %v4936_v31  ;;  %3313 = vmatprep.subr.bf16.mxu0 %v4939_v32 }
 0x1b7   : > { %3208 = vmatpush1.bf16.msra.mxu1 %v4934_v34  ;;  %3314 = vmatpush1.bf16.msra.mxu0 %v4937_v24 }
 0x1b8   : > { %3209 = vmatprep.subr.bf16.mxu1 %v4942_v35  ;;  %3315 = vmatprep.subr.bf16.mxu0 %v4945_v37 }
 0x1bb   : > { %3210 = vmatpush1.bf16.msra.mxu1 %v4940_v38  ;;  %3316 = vmatpush1.bf16.msra.mxu0 %v4943_v39 }
 0x1bc   : > { %3211 = vmatprep.subr.bf16.mxu1 %v4948_v40  ;;  %3317 = vmatprep.subr.bf16.mxu0 %v4951_v41 }
 0x1bf   : > { %3212 = vmatpush1.bf16.msra.mxu1 %v4946_v42  ;;  %3318 = vmatpush1.bf16.msra.mxu0 %v4949_v43 }
 0x1c0   : > { %3213 = vmatprep.subr.bf16.mxu1 %v4954_v45  ;;  %3319 = vmatprep.subr.bf16.mxu0 %v4957_v46 }
 0x1c3   : > { %3214 = vmatpush1.bf16.msra.mxu1 %v4952_v47  ;;  %3320 = vmatpush1.bf16.msra.mxu0 %v4955_v48 }
 0x1c4   : > { %3215 = vmatprep.subr.bf16.mxu1 %v4960_v49  ;;  %3321 = vmatprep.subr.bf16.mxu0 %v4963_v53 }
 0x1c7   : > { %3216 = vmatpush1.bf16.msra.mxu1 %v4958_v50  ;;  %3322 = vmatpush1.bf16.msra.mxu0 %v4961_v52 }
 0x1c8   : > { %3217 = vmatprep.subr.bf16.mxu1 %v4966_v60  ;;  %3323 = vmatprep.subr.bf16.mxu0 %v4969_v58 }
 0x1cb   : > { %3218 = vmatpush1.bf16.msra.mxu1 %v4964_v55  ;;  %3324 = vmatpush1.bf16.msra.mxu0 %v4967_v56 }
 0x1cc   : > { %3219 = vmatprep.subr.bf16.mxu1 %v4972_v33  ;;  %3325 = vmatprep.subr.bf16.mxu0 %v4975_v61 }
 0x1cf   : > { %3220 = vmatpush1.bf16.msra.mxu1 %v4970_v62  ;;  %3326 = vmatpush1.bf16.msra.mxu0 %v4973_v63 }
 0x1d2   : > { %3222 = vmatmul.mubr.bf16.vlgmr.msra.gmra.mrb[24].mxu1 %v5774_v54  ;;  %3328 = vmatmul.mubr.bf16.vlgmr.msra.gmra.mrb[36].mxu0 %v5774_v54  ;;  %v3386_v54 = vld [vmem:[%s6183_s8] sm:$0xf] }
 0x1d3   : > { %3231 = vmatprep.mubr.bf16.mxu1 %v2487_v0  ;;  %3337 = vmatprep.mubr.bf16.mxu0 %v2487_v0  ;;  %v5992_v4 = vrot.slane %v3386_v54, %v3352_v1  ;;  %v5994_v8 = vrot.slane %v3386_v54, %v3360_v2  ;;  %v5996_v11 = vrot.slane %v3386_v54, %v3356_v51 }
 0x1d4   : > { %v5998_v36 = vrot.slane %v3386_v54, %v3364_v57 }
 0x1da   : > { %3232 = vmatmul.mubr.bf16.gmra.mrb[28].mxu1 %v5790_v59  ;;  %3338 = vmatmul.mubr.bf16.gmra.mrb[40].mxu0 %v5790_v59  ;;  %v5988_v59 = vrot.slane %v3348_v3, %v3356_v51 }
 0x2a5   : > { %v3223_v9 = vpop.f32.mrb[24].mxu1  ;;  %v3329_v10 = vpop.f32.mrb[36].mxu0 }
 0x2a6   : > { %v3370_v12 = vmul.f32 %v5984_v5, %v3223_v9  ;;  %v3372_v13 = vmul.f32 %v5986_v6, %v3329_v10  ;;  %v3225_v14 = vpop.f32.mrb[25].mxu1  ;;  %v3331_v15 = vpop.f32.mrb[37].mxu0 }
 0x2a7   : > { %v3371_v16 = vmul.f32 %v5988_v59, %v3225_v14  ;;  %v3373_v17 = vmul.f32 %v5990_v7, %v3331_v15  ;;  %v3227_v18 = vpop.f32.mrb[26].mxu1  ;;  %v3333_v19 = vpop.f32.mrb[38].mxu0 }
 0x2a8   : > { %v3408_v20 = vadd.f32 %v5992_v4, %v3370_v12  ;;  %v3410_v21 = vadd.f32 %v5994_v8, %v3372_v13  ;;  %v3374_v22 = vmul.f32 %v5984_v5, %v3227_v18  ;;  %v3376_v23 = vmul.f32 %v5986_v6, %v3333_v19  ;;  %v3229_v25 = vpop.f32.mrb[27].mxu1  ;;  %v3335_v26 = vpop.f32.mrb[39].mxu0 }
 0x2a9   : > { %v3409_v27 = vadd.f32 %v5996_v11, %v3371_v16  ;;  %v3411_v28 = vadd.f32 %v5998_v36, %v3373_v17  ;;  %v3375_v29 = vmul.f32 %v5988_v59, %v3229_v25  ;;  %v3377_v30 = vmul.f32 %v5990_v7, %v3335_v26 }
 0x2aa   : > { %v3424_v31 = vmax.f32 %v3408_v20, 0.0  ;;  %v3426_v32 = vmax.f32 %v3410_v21, 0.0  ;;  %v3412_v34 = vadd.f32 %v5992_v4, %v3374_v22  ;;  %v3414_v24 = vadd.f32 %v5994_v8, %v3376_v23 }
 0x2ab   : > { %v3425_v35 = vmax.f32 %v3409_v27, 0.0  ;;  %v3427_v37 = vmax.f32 %v3411_v28, 0.0  ;;  %v3413_v38 = vadd.f32 %v5996_v11, %v3375_v29  ;;  %v3415_v39 = vadd.f32 %v5998_v36, %v3377_v30 }
 0x2ac   : > { %v3428_v40 = vmax.f32 %v3412_v34, 0.0  ;;  %v3430_v41 = vmax.f32 %v3414_v24, 0.0 }
 0x2ad   : > { %v3456_v42 = vcombine.low %v3424_v31, %v3425_v35  ;;  %v3457_v43 = vcombine.high %v3424_v31, %v3425_v35  ;;  %v3458_v45 = vcombine.low %v3426_v32, %v3427_v37  ;;  %v3459_v46 = vcombine.high %v3426_v32, %v3427_v37  ;;  %v3233_v47 = vpop.f32.mrb[28].mxu1  ;;  %v3339_v48 = vpop.f32.mrb[40].mxu0 }
 0x2ae   : > { %v3429_v49 = vmax.f32 %v3413_v38, 0.0  ;;  %v3431_v53 = vmax.f32 %v3415_v39, 0.0  ;;  %v6024_v50 = vmul.f32 %v5984_v5, %v3233_v47  ;;  %v6026_v52 = vpop.f32.mrb[29].mxu1  ;;  %v6028_v60 = vpop.f32.mrb[41].mxu0 }
 0x2af   : > { %v3466_v58 = vrot.slane %v3456_v42, %v5747_v44  ;;  %v3473_v55 = vrot.slane %v3457_v43, %v5747_v44  ;;  %v3480_v56 = vrot.slane %v3458_v45, %v5747_v44  ;;  %v3487_v33 = vrot.slane %v3459_v46, %v5747_v44  ;;  %v6034_v61 = vpop.f32.mrb[30].mxu1  ;;  %v6036_v62 = vpop.f32.mrb[42].mxu0 }
 0x2b0   : > { %v3524_v63 = vcombine.low %v3428_v40, %v3429_v49  ;;  %v3525_v0 = vcombine.high %v3428_v40, %v3429_v49  ;;  %v3526_v1 = vcombine.low %v3430_v41, %v3431_v53  ;;  %v3527_v2 = vcombine.high %v3430_v41, %v3431_v53  ;;  %v6044_v3 = vpop.f32.mrb[31].mxu1  ;;  %v6046_v51 = vpop.f32.mrb[43].mxu0 }
 0x2b1   : > { %v3488_v57 = vcombine.low %v3466_v58, %v3480_v56  ;;  %v3489_v54 = vcombine.high %v3466_v58, %v3480_v56  ;;  %v3490_v9 = vcombine.low %v3473_v55, %v3487_v33  ;;  %v3491_v10 = vcombine.high %v3473_v55, %v3487_v33 }
 0x2b2   : > { %v3534_v12 = vrot.slane %v3524_v63, %v5747_v44  ;;  %v3541_v13 = vrot.slane %v3525_v0, %v5747_v44  ;;  %v3548_v14 = vrot.slane %v3526_v1, %v5747_v44  ;;  %v3555_v15 = vrot.slane %v3527_v2, %v5747_v44 }
 0x2b3   : > { %v3498_v16 = vrot.slane %v3488_v57, %v5747_v44  ;;  %v3505_v17 = vrot.slane %v3490_v9, %v5747_v44  ;;  %v3512_v18 = vrot.slane %v3489_v54, %v5747_v44  ;;  %v3519_v19 = vrot.slane %v3491_v10, %v5747_v44 }
 0x2b4   : > { %v3556_v20 = vcombine.low %v3534_v12, %v3548_v14  ;;  %v3557_v21 = vcombine.high %v3534_v12, %v3548_v14  ;;  %v3558_v22 = vcombine.low %v3541_v13, %v3555_v15  ;;  %v3559_v23 = vcombine.high %v3541_v13, %v3555_v15 }
 0x2b5   : > { %v3521_v25 = vcombine.high %v3505_v17, %v3505_v17  ;;  %v3523_v26 = vcombine.high %v3519_v19, %v3519_v19  ;;  %v3694_v27 = vcombine.low %v3498_v16, %v3512_v18  ;;  %v4423_v28 = vcombine.high %v3498_v16, %v3512_v18 }
 0x2b6   : > { %v3696_v29 = vcombine.low %v3505_v17, %v3519_v19  ;;  %v3566_v30 = vrot.slane %v3556_v20, %v5747_v44  ;;  %v6060_v31 = vrot.slane %v3558_v22, %v5747_v44  ;;  %v3580_v32 = vrot.slane %v3557_v21, %v5747_v44 }
 0x2b7   : > { %v3703_v34 = vrot.slane %v3694_v27, %v5747_v44  ;;  %v3710_v24 = vrot.slane %v4423_v28, %v5747_v44  ;;  %v3724_v35 = vrot.slane %v3521_v25, %v5747_v44  ;;  %v6067_v37 = vrot.slane %v3559_v23, %v5747_v44 }
 0x2b8   : > { %v3717_v38 = vrot.slane %v3696_v29, %v5747_v44  ;;  %v3588_v39 = vcombine.high %v3566_v30, %v3566_v30  ;;  %v3590_v40 = vcombine.high %v3580_v32, %v3580_v32  ;;  %v3761_v41 = vcombine.low %v3523_v26, %v3566_v30 }
 0x2b9   : > { %v3725_v42 = vcombine.low %v3703_v34, %v3710_v24  ;;  %v3726_v43 = vcombine.high %v3703_v34, %v3710_v24  ;;  %v4424_v45 = vcombine.high %v6060_v31, %v6067_v37  ;;  %v3380_v46 = vmul.f32 %v5986_v6, %v3339_v48 }
 0x2ba   : > { %v3727_v47 = vcombine.low %v3717_v38, %v3724_v35  ;;  %v3728_v49 = vcombine.high %v3717_v38, %v3724_v35  ;;  %v3762_v53 = vcombine.low %v3580_v32, %v3588_v39  ;;  %v3763_v58 = vcombine.low %v3590_v40, %v6060_v31 }
 0x2bb   : > { %v3735_v55 = vrot.slane %v3725_v42, %v5747_v44  ;;  %v3742_v56 = vrot.slane %v3726_v43, %v5747_v44  ;;  %v3770_v33 = vrot.slane %v3761_v41, %v5747_v44  ;;  %v3791_v63 = vrot.slane %v6067_v37, %v5747_v44 }
 0x2bc   : > { %v3749_v0 = vrot.slane %v3727_v47, %v5747_v44  ;;  %v3756_v1 = vrot.slane %v3728_v49, %v5747_v44  ;;  %v3777_v48 = vrot.slane %v3762_v53, %v5747_v44  ;;  %v3784_v2 = vrot.slane %v3763_v58, %v5747_v44 }
 0x2bd   : > { %v3416_v57 = vadd.f32 %v5992_v4, %v6024_v50  ;;  %v3418_v54 = vadd.f32 %v5994_v8, %v3380_v46  ;;  %v3379_v9 = vmul.f32 %v5988_v59, %v6026_v52  ;;  %v3381_v10 = vmul.f32 %v5990_v7, %v6028_v60 }
 0x2be   : > { %v3757_v12 = vcombine.low %v3735_v55, %v3749_v0  ;;  %v3758_v13 = vcombine.high %v3735_v55, %v3749_v0  ;;  %v3759_v14 = vcombine.low %v3742_v56, %v3756_v1  ;;  %v3760_v15 = vcombine.high %v3742_v56, %v3756_v1 }
 0x2bf   : > { %v3792_v16 = vcombine.low %v3770_v33, %v3777_v48  ;;  %v3793_v17 = vcombine.high %v3770_v33, %v3777_v48  ;;  %v3794_v18 = vcombine.low %v3784_v2, %v3791_v63  ;;  %v3795_v19 = vcombine.high %v3784_v2, %v3791_v63 }
 0x2c0   : > { %3978 = vst [vmem:[%s6086_s20] sm:$0x7f] %v3757_v12  ;;  %3979 = vst [vmem:[%s6086_s20 + $0x8] sm:$0x7f] %v3759_v14  ;;  %v3432_v50 = vmax.f32 %v3416_v57, 0.0  ;;  %v3434_v20 = vmax.f32 %v3418_v54, 0.0  ;;  %v3417_v21 = vadd.f32 %v5996_v11, %v3379_v9  ;;  %v3419_v52 = vadd.f32 %v5998_v36, %v3381_v10 }
 0x2c1   : > { %3980 = vst [vmem:[%s6086_s20 + $0x10] sm:$0x7f] %v3758_v13  ;;  %3981 = vst [vmem:[%s6086_s20 + $0x18] sm:$0x7f] %v3760_v15  ;;  %v3802_v60 = vrot.slane %v3792_v16, %v5747_v44  ;;  %v3809_v22 = vrot.slane %v3793_v17, %v5747_v44  ;;  %v3816_v23 = vrot.slane %v3794_v18, %v5747_v44 }
 0x2c2   : > { %v3823_v25 = vrot.slane %v3795_v19, %v5747_v44  ;;  %v3433_v26 = vmax.f32 %v3417_v21, 0.0  ;;  %v3435_v27 = vmax.f32 %v3419_v52, 0.0  ;;  %v3382_v28 = vmul.f32 %v5984_v5, %v6034_v61 }
 0x2c3   : > { %v3384_v29 = vmul.f32 %v5986_v6, %v6036_v62  ;;  %v3824_v30 = vcombine.low %v3802_v60, %v3816_v23  ;;  %v3825_v32 = vcombine.high %v3802_v60, %v3816_v23  ;;  %v3383_v5 = vmul.f32 %v5988_v59, %v6044_v3 }
 0x2c4   : > { %v3826_v34 = vcombine.low %v3809_v22, %v3823_v25  ;;  %v3827_v24 = vcombine.high %v3809_v22, %v3823_v25  ;;  %v3592_v35 = vcombine.low %v3432_v50, %v3433_v26  ;;  %v3593_v38 = vcombine.high %v3432_v50, %v3433_v26 }
 0x2c5   : > { %v3594_v39 = vcombine.low %v3434_v20, %v3435_v27  ;;  %v3595_v40 = vcombine.high %v3434_v20, %v3435_v27  ;;  %3982 = vst [vmem:[%s6086_s20 + $0x20] sm:$0x7f] %v3824_v30  ;;  %3984 = vst [vmem:[%s6086_s20 + $0x30] sm:$0x7f] %v3825_v32  ;;  %v3420_v41 = vadd.f32 %v5992_v4, %v3382_v28 }
 0x2c6   : > { %3983 = vst [vmem:[%s6086_s20 + $0x28] sm:$0x7f] %v3826_v34  ;;  %3985 = vst [vmem:[%s6086_s20 + $0x38] sm:$0x7f] %v3827_v24  ;;  %v3422_v42 = vadd.f32 %v5994_v8, %v3384_v29  ;;  %v3385_v6 = vmul.f32 %v5990_v7, %v6046_v51  ;;  %v3602_v61 = vrot.slane %v3592_v35, %v5747_v44 }
 0x2c7   : > { %v3609_v62 = vrot.slane %v3593_v38, %v5747_v44  ;;  %v3616_v43 = vrot.slane %v3594_v39, %v5747_v44  ;;  %v3623_v46 = vrot.slane %v3595_v40, %v5747_v44  ;;  %v3436_v47 = vmax.f32 %v3420_v41, 0.0 }
 0x2c8   : > { %v3438_v49 = vmax.f32 %v3422_v42, 0.0  ;;  %v3421_v4 = vadd.f32 %v5996_v11, %v3383_v5  ;;  %v3423_v8 = vadd.f32 %v5998_v36, %v3385_v6  ;;  %v3837_v36 = vrot.slane %v4424_v45, %v5747_v44 }
 0x2c9   : > { %v3624_v53 = vcombine.low %v3602_v61, %v3616_v43  ;;  %v3625_v58 = vcombine.high %v3602_v61, %v3616_v43  ;;  %v3626_v59 = vcombine.low %v3609_v62, %v3623_v46  ;;  %v3627_v3 = vcombine.high %v3609_v62, %v3623_v46 }
 0x2ca   : > { %v3437_v55 = vmax.f32 %v3421_v4, 0.0  ;;  %v3439_v7 = vmax.f32 %v3423_v8, 0.0 }
 0x2cb   : > { %v3634_v51 = vrot.slane %v3624_v53, %v5747_v44  ;;  %v3641_v56 = vrot.slane %v3626_v59, %v5747_v44  ;;  %v3648_v33 = vrot.slane %v3625_v58, %v5747_v44  ;;  %v3655_v63 = vrot.slane %v3627_v3, %v5747_v44 }
 0x2cc   : > { %v3660_v0 = vcombine.low %v3436_v47, %v3437_v55  ;;  %v3661_v1 = vcombine.low %v3438_v49, %v3439_v7 }
 0x2cd   : > { %v3657_v48 = vcombine.high %v3641_v56, %v3641_v56  ;;  %v3829_v11 = vcombine.low %v3634_v51, %v3648_v33  ;;  %v4425_v2 = vcombine.high %v3634_v51, %v3648_v33  ;;  %v3858_v12 = vrot.slane %v3641_v56, %v5747_v44 }
 0x2ce   : > { %v3668_v57 = vrot.slane %v3660_v0, %v5747_v44  ;;  %v3675_v54 = vrot.slane %v3661_v1, %v5747_v44  ;;  %v3659_v14 = vcombine.high %v3655_v63, %v3655_v63 }
 0x2cf   : > { %v3844_v9 = vrot.slane %v3829_v11, %v5747_v44  ;;  %v3851_v10 = vrot.slane %v4425_v2, %v5747_v44  ;;  %v3895_v13 = vcombine.low %v3655_v63, %v3657_v48 }
 0x2d0   : > { %v3676_v15 = vcombine.low %v3668_v57, %v3675_v54  ;;  %v3677_v16 = vcombine.high %v3668_v57, %v3675_v54 }
 0x2d1   : > { %v3859_v17 = vcombine.low %v3837_v36, %v3844_v9  ;;  %v3860_v18 = vcombine.high %v3837_v36, %v3844_v9  ;;  %v3861_v19 = vcombine.low %v3851_v10, %v3858_v12  ;;  %v3862_v50 = vcombine.high %v3851_v10, %v3858_v12 }
 0x2d2   : > { %v3684_v31 = vrot.slane %v3676_v15, %v5747_v44  ;;  %v3691_v37 = vrot.slane %v3677_v16, %v5747_v44  ;;  %v3904_v60 = vrot.slane %v3895_v13, %v5747_v44 }
 0x2d3   : > { %v3869_v45 = vrot.slane %v3859_v17, %v5747_v44  ;;  %v3876_v20 = vrot.slane %v3860_v18, %v5747_v44  ;;  %v3883_v21 = vrot.slane %v3861_v19, %v5747_v44  ;;  %v3890_v52 = vrot.slane %v3862_v50, %v5747_v44 }
 0x2d4   : > { %v3692_v22 = vcombine.high %v3684_v31, %v3684_v31  ;;  %v3693_v23 = vcombine.high %v3691_v37, %v3691_v37  ;;  %v3896_v25 = vcombine.low %v3659_v14, %v3684_v31 }
 0x2d5   : > { %v3891_v26 = vcombine.low %v3869_v45, %v3883_v21  ;;  %v3892_v27 = vcombine.high %v3869_v45, %v3883_v21  ;;  %v3893_v28 = vcombine.low %v3876_v20, %v3890_v52  ;;  %v3894_v29 = vcombine.high %v3876_v20, %v3890_v52 }
 0x2d6   : > { %v3897_v30 = vcombine.low %v3691_v37, %v3692_v22  ;;  %v3911_v32 = vrot.slane %v3896_v25, %v5747_v44  ;;  %v3925_v24 = vrot.slane %v3693_v23, %v5747_v44 }
 0x2d7   : > { %3986 = vst [vmem:[%s6086_s20 + $0x40] sm:$0x7f] %v3891_v26  ;;  %3987 = vst [vmem:[%s6086_s20 + $0x48] sm:$0x7f] %v3893_v28 }
 0x2d8   : > { %3988 = vst [vmem:[%s6086_s20 + $0x50] sm:$0x7f] %v3892_v27  ;;  %3989 = vst [vmem:[%s6086_s20 + $0x58] sm:$0x7f] %v3894_v29  ;;  %v3918_v34 = vrot.slane %v3897_v30, %v5747_v44  ;;  %v3926_v35 = vcombine.low %v3904_v60, %v3911_v32  ;;  %v3927_v38 = vcombine.high %v3904_v60, %v3911_v32 }
 0x2da   : > { %v3928_v39 = vcombine.low %v3918_v34, %v3925_v24  ;;  %v3929_v40 = vcombine.high %v3918_v34, %v3925_v24  ;;  %v3936_v41 = vrot.slane %v3926_v35, %v5747_v44  ;;  %v3943_v42 = vrot.slane %v3927_v38, %v5747_v44 }
 0x2dc   : > { %v3950_v5 = vrot.slane %v3928_v39, %v5747_v44  ;;  %v3957_v6 = vrot.slane %v3929_v40, %v5747_v44 }
 0x2de   : > { %v3958_v61 = vcombine.low %v3936_v41, %v3950_v5  ;;  %v3959_v62 = vcombine.high %v3936_v41, %v3950_v5  ;;  %v3960_v43 = vcombine.low %v3943_v42, %v3957_v6  ;;  %v3961_v46 = vcombine.high %v3943_v42, %v3957_v6 }
 0x2e0   : > { %3990 = vst [vmem:[%s6086_s20 + $0x60] sm:$0x7f] %v3958_v61  ;;  %3991 = vst [vmem:[%s6086_s20 + $0x68] sm:$0x7f] %v3960_v43 }
 0x2e1   : > { %3992 = vst [vmem:[%s6086_s20 + $0x70] sm:$0x7f] %v3959_v62  ;;  %3993 = vst [vmem:[%s6086_s20 + $0x78] sm:$0x7f] %v3961_v46 }
 0x2e2 PF: > { %s19_s13 = sadd.s32 1, %s5014_s13   ;;  %s6192_s30 = smov %s5006_s11 }
 0x2e3   : > { %p16_p7 = scmp.ge.s32.totalorder %s19_s13, 6   ;;  %s6193_s10 = smov %s5010_s12 }
 0x2e4   : > { %s6194_s11 = smov %s6197_s14  ;;  %s6195_s12 = smov %s6201_s15 }
 0x2e5   :  { %18 = sbr.rel (!%p16_p7) target bundleno = 3 (0x3), region = 90 }

</bundles_post_ra>
